<compile_context>
chip_gen: v7x
topology: tpu7x:2x2x1
jax: 0.10.0
libtpu: 0.0.40
codegen_flags: <defaults>
</compile_context>

<pallas_src>
import functools

import jax
import jax.numpy as jnp
from jax.experimental import pallas as pl
from jax.experimental.pallas import tpu as pltpu

COMPUTE_DTYPE = jnp.bfloat16  # MXU-native on v5e/v6e/v7x; accumulation stays f32.

_MAX_TB = 512   # batch tile (sublane-aligned); larger tiles -> fewer weight re-streams
_MAX_TO = 512   # output tile (lane-aligned -> unmasked stores when O >= 128)
_MAX_FI = 32    # max i-rows handled (unrolled) per grid step; bounds body size


def _vmem_cap_bytes():
    try:
        return pltpu.get_tpu_info().vmem_capacity_bytes
    except Exception:  # interpret mode / older runtimes
        return 64 * 1024 * 1024  # v7x-sized fallback


def _largest_tile(dim, cap, align):
    """Largest multiple of `align` that divides `dim` and is <= cap, else full dim."""
    t = (min(dim, cap) // align) * align
    while t >= align:
        if dim % t == 0:
            return t
        t -= align
    return dim  # a block equal to the full array dim is always legal


def _choose_fi(F, tb, to, budget):
    """Rows of the bilinear form handled per grid step (weight tile = (fi*F, to))."""
    itemsize = jnp.dtype(COMPUTE_DTYPE).itemsize
    # VMEM besides the double-buffered weight tile: f32 accumulator, output block,
    # f32 feature blocks, bias (all double-buffered where pipelined).
    fixed = (tb * to * 4 + 2 * tb * to * 4 + 2 * 2 * tb * F * 4 + 2 * to * 4)
    per_fi = 2 * itemsize * F * to          # double-buffered weight rows for one i
    avail = max(budget - fixed, per_fi)
    cap = max(1, min(F, _MAX_FI, avail // per_fi))
    for fi in range(int(cap), 0, -1):
        # fi must divide F (exact grid) and keep the weight block sublane-aligned.
        if F % fi == 0 and (fi * F) % 8 == 0:
            return fi
    # TODO(synk): if F is large and not 8-aligned this unrolls F matmuls; use a
    # fori_loop with dynamic sublane slicing instead for that pathological case.
    return F  # single reduction step (block first dim == full F*F is always legal)


def bilinear_kernel(f1_ref, f2_ref, w_ref, b_ref, out_ref, acc_ref, *, fi, F):
    # f1, f2: (tb, F) f32;  w: (fi*F, to) bf16;  b: (1, to) f32;  out: (tb, to) f32.
    k = pl.program_id(2)

    @pl.when(k == 0)
    def _init():
        acc_ref[...] = jnp.zeros_like(acc_ref)

    f1 = f1_ref[...]                                   # (tb, F) f32
    f2 = f2_ref[...].astype(COMPUTE_DTYPE)             # (tb, F) bf16
    lane = jax.lax.broadcasted_iota(jnp.int32, f1.shape, 1)
    i_base = k * fi

    partial = None
    for il in range(fi):                               # static unroll
        w_il = w_ref[pl.ds(il * F, F), :]              # (F, to) bf16, static slice
        t = jnp.dot(f2, w_il, preferred_element_type=jnp.float32)   # (tb, to) MXU
        # feat_1 column i_base+il, kept along sublanes: mask + lane-reduce (XLU).
        col = jnp.sum(jnp.where(lane == (i_base + il), f1, 0.0),
                      axis=1, keepdims=True)           # (tb, 1) f32
        term = col * t
        partial = term if partial is None else partial + term

    acc_ref[...] += partial                            # one VMEM RMW per grid step

    @pl.when(k == pl.num_programs(2) - 1)
    def _finalize():
        out_ref[...] = (acc_ref[...] + b_ref[...]).astype(out_ref.dtype)


def prepare_bilinear_params(weight, bias):
    """One-time (init-time) parameter prep, hoisted out of the per-call path.

    weight: (O, F, F) as in nn.Bilinear -> Wf: (F*F, O) with
    Wf[i*F + j, o] = weight[o, i, j], cast to the MXU compute dtype.
    """
    O, F, _ = weight.shape
    wf = jnp.transpose(weight, (1, 2, 0)).reshape(F * F, O).astype(COMPUTE_DTYPE)
    bias2d = bias.astype(jnp.float32).reshape(1, O)
    return wf, bias2d


@jax.jit
def bilinear_forward(feat_1, feat_2, wf, bias2d):
    """feat_1, feat_2: (B, F); wf: (F*F, O) bf16; bias2d: (1, O) f32 -> (B, O) f32."""
    B, F = feat_1.shape
    K, O = wf.shape
    assert K == F * F, "weight must be pre-flattened with prepare_bilinear_params"

    cap = _vmem_cap_bytes()
    budget = cap // 8
    tb = _largest_tile(B, _MAX_TB, 8)
    to = _largest_tile(O, _MAX_TO, 128)
    fi = _choose_fi(F, tb, to, budget)
    grid = (B // tb, O // to, F // fi)

    kernel = functools.partial(bilinear_kernel, fi=fi, F=F)

    return pl.pallas_call(
        kernel,
        out_shape=jax.ShapeDtypeStruct((B, O), jnp.float32),
        grid_spec=pltpu.PrefetchScalarGridSpec(
            num_scalar_prefetch=0,
            grid=grid,
            in_specs=[
                # feature blocks depend only on the batch tile -> DMA'd once per tile
                pl.BlockSpec((tb, F), lambda i, j, k: (i, 0)),        # feat_1 (f32)
                pl.BlockSpec((tb, F), lambda i, j, k: (i, 0)),        # feat_2 (f32)
                pl.BlockSpec((fi * F, to), lambda i, j, k: (k, j)),   # Wf (dominant stream)
                pl.BlockSpec((1, to), lambda i, j, k: (0, j)),        # bias
            ],
            out_specs=pl.BlockSpec((tb, to), lambda i, j, k: (i, j)),
            scratch_shapes=[pltpu.VMEM((tb, to), jnp.float32)],
        ),
        compiler_params=pltpu.CompilerParams(
            # B and O tiles are independent -> megacore-shardable (v7x 2 TCs);
            # the i-reduction axis is in-place and must stay "arbitrary".
            dimension_semantics=("parallel", "parallel", "arbitrary"),
            vmem_limit_bytes=int(min(cap // 2, 100 * 1024 * 1024)),
        ),
    )(feat_1.astype(jnp.float32), feat_2.astype(jnp.float32), wf, bias2d)


def bilinear_reference(feat_1, feat_2, weight, bias):
    # Pure-JAX reference of nn.Bilinear forward.
    return jnp.einsum("bi,oij,bj->bo", feat_1, weight, feat_2) + bias[None, :]


if __name__ == "__main__":
    B, F, O = 8, 32, 16  # batch, feat_size, output_size

    key = jax.random.PRNGKey(0)
    k1, k2, kw, kb = jax.random.split(key, 4)

    # Deterministic parameter init mimicking nn.Bilinear: U(-1/sqrt(F), 1/sqrt(F)).
    bound = 1.0 / (F ** 0.5)
    weight = jax.random.uniform(kw, (O, F, F), jnp.float32, -bound, bound)
    bias = jax.random.uniform(kb, (O,), jnp.float32, -bound, bound)

    feat_1 = jax.random.normal(k1, (B, F), jnp.float32)
    feat_2 = jax.random.normal(k2, (B, F), jnp.float32)

    wf, bias2d = prepare_bilinear_params(weight, bias)   # hoisted: once, not per call
    out = jax.block_until_ready(bilinear_forward(feat_1, feat_2, wf, bias2d))

    ref = bilinear_reference(feat_1, feat_2, weight, bias)
    assert out.shape == (B, O)
    # bf16 matmul operands with f32 accumulation -> ~1e-2 relative error budget.
    max_err = float(jnp.max(jnp.abs(out - ref)))
    assert jnp.allclose(out, ref, atol=1e-1, rtol=5e-2), f"max abs err = {max_err}"
    print("KERNEL_OK")
</pallas_src>

<mosaic_0001>
module attributes {stable_mosaic.version = 11 : i64} {
  func.func @bilinear_kernel(%arg0: i32, %arg1: i32, %arg2: i32, %arg3: memref<8x32xf32, #tpu.memory_space<vmem>>, %arg4: memref<8x32xf32, #tpu.memory_space<vmem>>, %arg5: memref<1024x16xbf16, #tpu.memory_space<vmem>>, %arg6: memref<1x16xf32, #tpu.memory_space<vmem>>, %arg7: memref<8x16xf32, #tpu.memory_space<vmem>>, %arg8: memref<8x16xf32, #tpu.memory_space<vmem>>) attributes {dimension_semantics = [#tpu.dimension_semantics<parallel>, #tpu.dimension_semantics<parallel>, #tpu.dimension_semantics<arbitrary>], iteration_bounds = array<i64: 1, 1, 1>, scalar_prefetch = 0 : i64, scratch_operands = 1 : i64, tpu.core_type = #tpu.core_type<tc>, window_params = [{transform_indices = @transform_0, window_bounds = array<i64: 8, 32>}, {transform_indices = @transform_1, window_bounds = array<i64: 8, 32>}, {transform_indices = @transform_2, window_bounds = array<i64: 1024, 16>}, {transform_indices = @transform_3, window_bounds = array<i64: 1, 16>}, {transform_indices = @transform_4, window_bounds = array<i64: 8, 16>}]} {
    %c0_i32 = arith.constant 0 : i32
    %0 = arith.cmpi eq, %arg2, %c0_i32 : i32
    %1 = arith.extui %0 : i1 to i32
    %c0_i32_0 = arith.constant 0 : i32
    %2 = arith.cmpi ne, %1, %c0_i32_0 : i32
    scf.if %2 {
      %cst_139 = arith.constant 0.000000e+00 : f32
      %397 = vector.broadcast %cst_139 : f32 to vector<8x16xf32>
      %c0_140 = arith.constant 0 : index
      %c0_141 = arith.constant 0 : index
      %398 = vector.load %arg8[%c0_140, %c0_141] : memref<8x16xf32, #tpu.memory_space<vmem>>, vector<8x16xf32>
      tpu.vector_store %arg8[%c0_140, %c0_141], %397 {strides = array<i32>} : memref<8x16xf32, #tpu.memory_space<vmem>>, vector<8x16xf32>,
    } else {
    }
    %c0 = arith.constant 0 : index
    %c0_1 = arith.constant 0 : index
    %3 = vector.load %arg3[%c0, %c0_1] : memref<8x32xf32, #tpu.memory_space<vmem>>, vector<8x32xf32>
    %c0_2 = arith.constant 0 : index
    %c0_3 = arith.constant 0 : index
    %4 = vector.load %arg4[%c0_2, %c0_3] : memref<8x32xf32, #tpu.memory_space<vmem>>, vector<8x32xf32>
    %5 = arith.truncf %4 : vector<8x32xf32> to vector<8x32xbf16>
    %6 = tpu.iota {dimensions = array<i32: 1>} : vector<8x32xi32>
    %c32_i32 = arith.constant 32 : i32
    %7 = arith.muli %arg2, %c32_i32 : i32
    %c0_4 = arith.constant 0 : index
    %c0_5 = arith.constant 0 : index
    %8 = vector.load %arg5[%c0_4, %c0_5] : memref<1024x16xbf16, #tpu.memory_space<vmem>>, vector<32x16xbf16>
    %cst = arith.constant dense<0.000000e+00> : vector<8x16xf32>
    %9 = tpu.matmul %5, %8, %cst {dimension_numbers = #tpu.dot_dimension_numbers<[1], [0], [0], [1], [0, 0, 1, 1], [], []>} : vector<8x32xbf16>, vector<32x16xbf16>, vector<8x16xf32> -> vector<8x16xf32>
    %c0_i32_6 = arith.constant 0 : i32
    %10 = arith.addi %7, %c0_i32_6 : i32
    %11 = vector.broadcast %10 : i32 to vector<8x32xi32>
    %12 = arith.cmpi eq, %6, %11 : vector<8x32xi32>
    %cst_7 = arith.constant 0.000000e+00 : f32
    %13 = vector.broadcast %cst_7 : f32 to vector<8x32xf32>
    %14 = arith.select %12, %3, %13 : vector<8x32xi1>, vector<8x32xf32>
    %cst_8 = arith.constant dense<0.000000e+00> : vector<8xf32>
    %15 = vector.multi_reduction <add>, %14, %cst_8 [1] : vector<8x32xf32> to vector<8xf32>
    %16 = vector.shape_cast %15 : vector<8xf32> to vector<8x1xf32>
    %17 = vector.broadcast %16 : vector<8x1xf32> to vector<8x16xf32>
    %18 = arith.mulf %17, %9 : vector<8x16xf32>
    %c32 = arith.constant 32 : index
    %c0_9 = arith.constant 0 : index
    %19 = vector.load %arg5[%c32, %c0_9] : memref<1024x16xbf16, #tpu.memory_space<vmem>>, vector<32x16xbf16>
    %cst_10 = arith.constant dense<0.000000e+00> : vector<8x16xf32>
    %20 = tpu.matmul %5, %19, %cst_10 {dimension_numbers = #tpu.dot_dimension_numbers<[1], [0], [0], [1], [0, 0, 1, 1], [], []>} : vector<8x32xbf16>, vector<32x16xbf16>, vector<8x16xf32> -> vector<8x16xf32>
    %c1_i32 = arith.constant 1 : i32
    %21 = arith.addi %7, %c1_i32 : i32
    %22 = vector.broadcast %21 : i32 to vector<8x32xi32>
    %23 = arith.cmpi eq, %6, %22 : vector<8x32xi32>
    %cst_11 = arith.constant 0.000000e+00 : f32
    %24 = vector.broadcast %cst_11 : f32 to vector<8x32xf32>
    %25 = arith.select %23, %3, %24 : vector<8x32xi1>, vector<8x32xf32>
    %cst_12 = arith.constant dense<0.000000e+00> : vector<8xf32>
    %26 = vector.multi_reduction <add>, %25, %cst_12 [1] : vector<8x32xf32> to vector<8xf32>
    %27 = vector.shape_cast %26 : vector<8xf32> to vector<8x1xf32>
    %28 = vector.broadcast %27 : vector<8x1xf32> to vector<8x16xf32>
    %29 = arith.mulf %28, %20 : vector<8x16xf32>
    %30 = arith.addf %18, %29 : vector<8x16xf32>
    %c64 = arith.constant 64 : index
    %c0_13 = arith.constant 0 : index
    %31 = vector.load %arg5[%c64, %c0_13] : memref<1024x16xbf16, #tpu.memory_space<vmem>>, vector<32x16xbf16>
    %cst_14 = arith.constant dense<0.000000e+00> : vector<8x16xf32>
    %32 = tpu.matmul %5, %31, %cst_14 {dimension_numbers = #tpu.dot_dimension_numbers<[1], [0], [0], [1], [0, 0, 1, 1], [], []>} : vector<8x32xbf16>, vector<32x16xbf16>, vector<8x16xf32> -> vector<8x16xf32>
    %c2_i32 = arith.constant 2 : i32
    %33 = arith.addi %7, %c2_i32 : i32
    %34 = vector.broadcast %33 : i32 to vector<8x32xi32>
    %35 = arith.cmpi eq, %6, %34 : vector<8x32xi32>
    %cst_15 = arith.constant 0.000000e+00 : f32
    %36 = vector.broadcast %cst_15 : f32 to vector<8x32xf32>
    %37 = arith.select %35, %3, %36 : vector<8x32xi1>, vector<8x32xf32>
    %cst_16 = arith.constant dense<0.000000e+00> : vector<8xf32>
    %38 = vector.multi_reduction <add>, %37, %cst_16 [1] : vector<8x32xf32> to vector<8xf32>
    %39 = vector.shape_cast %38 : vector<8xf32> to vector<8x1xf32>
    %40 = vector.broadcast %39 : vector<8x1xf32> to vector<8x16xf32>
    %41 = arith.mulf %40, %32 : vector<8x16xf32>
    %42 = arith.addf %30, %41 : vector<8x16xf32>
    %c96 = arith.constant 96 : index
    %c0_17 = arith.constant 0 : index
    %43 = vector.load %arg5[%c96, %c0_17] : memref<1024x16xbf16, #tpu.memory_space<vmem>>, vector<32x16xbf16>
    %cst_18 = arith.constant dense<0.000000e+00> : vector<8x16xf32>
    %44 = tpu.matmul %5, %43, %cst_18 {dimension_numbers = #tpu.dot_dimension_numbers<[1], [0], [0], [1], [0, 0, 1, 1], [], []>} : vector<8x32xbf16>, vector<32x16xbf16>, vector<8x16xf32> -> vector<8x16xf32>
    %c3_i32 = arith.constant 3 : i32
    %45 = arith.addi %7, %c3_i32 : i32
    %46 = vector.broadcast %45 : i32 to vector<8x32xi32>
    %47 = arith.cmpi eq, %6, %46 : vector<8x32xi32>
    %cst_19 = arith.constant 0.000000e+00 : f32
    %48 = vector.broadcast %cst_19 : f32 to vector<8x32xf32>
    %49 = arith.select %47, %3, %48 : vector<8x32xi1>, vector<8x32xf32>
    %cst_20 = arith.constant dense<0.000000e+00> : vector<8xf32>
    %50 = vector.multi_reduction <add>, %49, %cst_20 [1] : vector<8x32xf32> to vector<8xf32>
    %51 = vector.shape_cast %50 : vector<8xf32> to vector<8x1xf32>
    %52 = vector.broadcast %51 : vector<8x1xf32> to vector<8x16xf32>
    %53 = arith.mulf %52, %44 : vector<8x16xf32>
    %54 = arith.addf %42, %53 : vector<8x16xf32>
    %c128 = arith.constant 128 : index
    %c0_21 = arith.constant 0 : index
    %55 = vector.load %arg5[%c128, %c0_21] : memref<1024x16xbf16, #tpu.memory_space<vmem>>, vector<32x16xbf16>
    %cst_22 = arith.constant dense<0.000000e+00> : vector<8x16xf32>
    %56 = tpu.matmul %5, %55, %cst_22 {dimension_numbers = #tpu.dot_dimension_numbers<[1], [0], [0], [1], [0, 0, 1, 1], [], []>} : vector<8x32xbf16>, vector<32x16xbf16>, vector<8x16xf32> -> vector<8x16xf32>
    %c4_i32 = arith.constant 4 : i32
    %57 = arith.addi %7, %c4_i32 : i32
    %58 = vector.broadcast %57 : i32 to vector<8x32xi32>
    %59 = arith.cmpi eq, %6, %58 : vector<8x32xi32>
    %cst_23 = arith.constant 0.000000e+00 : f32
    %60 = vector.broadcast %cst_23 : f32 to vector<8x32xf32>
    %61 = arith.select %59, %3, %60 : vector<8x32xi1>, vector<8x32xf32>
    %cst_24 = arith.constant dense<0.000000e+00> : vector<8xf32>
    %62 = vector.multi_reduction <add>, %61, %cst_24 [1] : vector<8x32xf32> to vector<8xf32>
    %63 = vector.shape_cast %62 : vector<8xf32> to vector<8x1xf32>
    %64 = vector.broadcast %63 : vector<8x1xf32> to vector<8x16xf32>
    %65 = arith.mulf %64, %56 : vector<8x16xf32>
    %66 = arith.addf %54, %65 : vector<8x16xf32>
    %c160 = arith.constant 160 : index
    %c0_25 = arith.constant 0 : index
    %67 = vector.load %arg5[%c160, %c0_25] : memref<1024x16xbf16, #tpu.memory_space<vmem>>, vector<32x16xbf16>
    %cst_26 = arith.constant dense<0.000000e+00> : vector<8x16xf32>
    %68 = tpu.matmul %5, %67, %cst_26 {dimension_numbers = #tpu.dot_dimension_numbers<[1], [0], [0], [1], [0, 0, 1, 1], [], []>} : vector<8x32xbf16>, vector<32x16xbf16>, vector<8x16xf32> -> vector<8x16xf32>
    %c5_i32 = arith.constant 5 : i32
    %69 = arith.addi %7, %c5_i32 : i32
    %70 = vector.broadcast %69 : i32 to vector<8x32xi32>
    %71 = arith.cmpi eq, %6, %70 : vector<8x32xi32>
    %cst_27 = arith.constant 0.000000e+00 : f32
    %72 = vector.broadcast %cst_27 : f32 to vector<8x32xf32>
    %73 = arith.select %71, %3, %72 : vector<8x32xi1>, vector<8x32xf32>
    %cst_28 = arith.constant dense<0.000000e+00> : vector<8xf32>
    %74 = vector.multi_reduction <add>, %73, %cst_28 [1] : vector<8x32xf32> to vector<8xf32>
    %75 = vector.shape_cast %74 : vector<8xf32> to vector<8x1xf32>
    %76 = vector.broadcast %75 : vector<8x1xf32> to vector<8x16xf32>
    %77 = arith.mulf %76, %68 : vector<8x16xf32>
    %78 = arith.addf %66, %77 : vector<8x16xf32>
    %c192 = arith.constant 192 : index
    %c0_29 = arith.constant 0 : index
    %79 = vector.load %arg5[%c192, %c0_29] : memref<1024x16xbf16, #tpu.memory_space<vmem>>, vector<32x16xbf16>
    %cst_30 = arith.constant dense<0.000000e+00> : vector<8x16xf32>
    %80 = tpu.matmul %5, %79, %cst_30 {dimension_numbers = #tpu.dot_dimension_numbers<[1], [0], [0], [1], [0, 0, 1, 1], [], []>} : vector<8x32xbf16>, vector<32x16xbf16>, vector<8x16xf32> -> vector<8x16xf32>
    %c6_i32 = arith.constant 6 : i32
    %81 = arith.addi %7, %c6_i32 : i32
    %82 = vector.broadcast %81 : i32 to vector<8x32xi32>
    %83 = arith.cmpi eq, %6, %82 : vector<8x32xi32>
    %cst_31 = arith.constant 0.000000e+00 : f32
    %84 = vector.broadcast %cst_31 : f32 to vector<8x32xf32>
    %85 = arith.select %83, %3, %84 : vector<8x32xi1>, vector<8x32xf32>
    %cst_32 = arith.constant dense<0.000000e+00> : vector<8xf32>
    %86 = vector.multi_reduction <add>, %85, %cst_32 [1] : vector<8x32xf32> to vector<8xf32>
    %87 = vector.shape_cast %86 : vector<8xf32> to vector<8x1xf32>
    %88 = vector.broadcast %87 : vector<8x1xf32> to vector<8x16xf32>
    %89 = arith.mulf %88, %80 : vector<8x16xf32>
    %90 = arith.addf %78, %89 : vector<8x16xf32>
    %c224 = arith.constant 224 : index
    %c0_33 = arith.constant 0 : index
    %91 = vector.load %arg5[%c224, %c0_33] : memref<1024x16xbf16, #tpu.memory_space<vmem>>, vector<32x16xbf16>
    %cst_34 = arith.constant dense<0.000000e+00> : vector<8x16xf32>
    %92 = tpu.matmul %5, %91, %cst_34 {dimension_numbers = #tpu.dot_dimension_numbers<[1], [0], [0], [1], [0, 0, 1, 1], [], []>} : vector<8x32xbf16>, vector<32x16xbf16>, vector<8x16xf32> -> vector<8x16xf32>
    %c7_i32 = arith.constant 7 : i32
    %93 = arith.addi %7, %c7_i32 : i32
    %94 = vector.broadcast %93 : i32 to vector<8x32xi32>
    %95 = arith.cmpi eq, %6, %94 : vector<8x32xi32>
    %cst_35 = arith.constant 0.000000e+00 : f32
    %96 = vector.broadcast %cst_35 : f32 to vector<8x32xf32>
    %97 = arith.select %95, %3, %96 : vector<8x32xi1>, vector<8x32xf32>
    %cst_36 = arith.constant dense<0.000000e+00> : vector<8xf32>
    %98 = vector.multi_reduction <add>, %97, %cst_36 [1] : vector<8x32xf32> to vector<8xf32>
    %99 = vector.shape_cast %98 : vector<8xf32> to vector<8x1xf32>
    %100 = vector.broadcast %99 : vector<8x1xf32> to vector<8x16xf32>
    %101 = arith.mulf %100, %92 : vector<8x16xf32>
    %102 = arith.addf %90, %101 : vector<8x16xf32>
    %c256 = arith.constant 256 : index
    %c0_37 = arith.constant 0 : index
    %103 = vector.load %arg5[%c256, %c0_37] : memref<1024x16xbf16, #tpu.memory_space<vmem>>, vector<32x16xbf16>
    %cst_38 = arith.constant dense<0.000000e+00> : vector<8x16xf32>
    %104 = tpu.matmul %5, %103, %cst_38 {dimension_numbers = #tpu.dot_dimension_numbers<[1], [0], [0], [1], [0, 0, 1, 1], [], []>} : vector<8x32xbf16>, vector<32x16xbf16>, vector<8x16xf32> -> vector<8x16xf32>
    %c8_i32 = arith.constant 8 : i32
    %105 = arith.addi %7, %c8_i32 : i32
    %106 = vector.broadcast %105 : i32 to vector<8x32xi32>
    %107 = arith.cmpi eq, %6, %106 : vector<8x32xi32>
    %cst_39 = arith.constant 0.000000e+00 : f32
    %108 = vector.broadcast %cst_39 : f32 to vector<8x32xf32>
    %109 = arith.select %107, %3, %108 : vector<8x32xi1>, vector<8x32xf32>
    %cst_40 = arith.constant dense<0.000000e+00> : vector<8xf32>
    %110 = vector.multi_reduction <add>, %109, %cst_40 [1] : vector<8x32xf32> to vector<8xf32>
    %111 = vector.shape_cast %110 : vector<8xf32> to vector<8x1xf32>
    %112 = vector.broadcast %111 : vector<8x1xf32> to vector<8x16xf32>
    %113 = arith.mulf %112, %104 : vector<8x16xf32>
    %114 = arith.addf %102, %113 : vector<8x16xf32>
    %c288 = arith.constant 288 : index
    %c0_41 = arith.constant 0 : index
    %115 = vector.load %arg5[%c288, %c0_41] : memref<1024x16xbf16, #tpu.memory_space<vmem>>, vector<32x16xbf16>
    %cst_42 = arith.constant dense<0.000000e+00> : vector<8x16xf32>
    %116 = tpu.matmul %5, %115, %cst_42 {dimension_numbers = #tpu.dot_dimension_numbers<[1], [0], [0], [1], [0, 0, 1, 1], [], []>} : vector<8x32xbf16>, vector<32x16xbf16>, vector<8x16xf32> -> vector<8x16xf32>
    %c9_i32 = arith.constant 9 : i32
    %117 = arith.addi %7, %c9_i32 : i32
    %118 = vector.broadcast %117 : i32 to vector<8x32xi32>
    %119 = arith.cmpi eq, %6, %118 : vector<8x32xi32>
    %cst_43 = arith.constant 0.000000e+00 : f32
    %120 = vector.broadcast %cst_43 : f32 to vector<8x32xf32>
    %121 = arith.select %119, %3, %120 : vector<8x32xi1>, vector<8x32xf32>
    %cst_44 = arith.constant dense<0.000000e+00> : vector<8xf32>
    %122 = vector.multi_reduction <add>, %121, %cst_44 [1] : vector<8x32xf32> to vector<8xf32>
    %123 = vector.shape_cast %122 : vector<8xf32> to vector<8x1xf32>
    %124 = vector.broadcast %123 : vector<8x1xf32> to vector<8x16xf32>
    %125 = arith.mulf %124, %116 : vector<8x16xf32>
    %126 = arith.addf %114, %125 : vector<8x16xf32>
    %c320 = arith.constant 320 : index
    %c0_45 = arith.constant 0 : index
    %127 = vector.load %arg5[%c320, %c0_45] : memref<1024x16xbf16, #tpu.memory_space<vmem>>, vector<32x16xbf16>
    %cst_46 = arith.constant dense<0.000000e+00> : vector<8x16xf32>
    %128 = tpu.matmul %5, %127, %cst_46 {dimension_numbers = #tpu.dot_dimension_numbers<[1], [0], [0], [1], [0, 0, 1, 1], [], []>} : vector<8x32xbf16>, vector<32x16xbf16>, vector<8x16xf32> -> vector<8x16xf32>
    %c10_i32 = arith.constant 10 : i32
    %129 = arith.addi %7, %c10_i32 : i32
    %130 = vector.broadcast %129 : i32 to vector<8x32xi32>
    %131 = arith.cmpi eq, %6, %130 : vector<8x32xi32>
    %cst_47 = arith.constant 0.000000e+00 : f32
    %132 = vector.broadcast %cst_47 : f32 to vector<8x32xf32>
    %133 = arith.select %131, %3, %132 : vector<8x32xi1>, vector<8x32xf32>
    %cst_48 = arith.constant dense<0.000000e+00> : vector<8xf32>
    %134 = vector.multi_reduction <add>, %133, %cst_48 [1] : vector<8x32xf32> to vector<8xf32>
    %135 = vector.shape_cast %134 : vector<8xf32> to vector<8x1xf32>
    %136 = vector.broadcast %135 : vector<8x1xf32> to vector<8x16xf32>
    %137 = arith.mulf %136, %128 : vector<8x16xf32>
    %138 = arith.addf %126, %137 : vector<8x16xf32>
    %c352 = arith.constant 352 : index
    %c0_49 = arith.constant 0 : index
    %139 = vector.load %arg5[%c352, %c0_49] : memref<1024x16xbf16, #tpu.memory_space<vmem>>, vector<32x16xbf16>
    %cst_50 = arith.constant dense<0.000000e+00> : vector<8x16xf32>
    %140 = tpu.matmul %5, %139, %cst_50 {dimension_numbers = #tpu.dot_dimension_numbers<[1], [0], [0], [1], [0, 0, 1, 1], [], []>} : vector<8x32xbf16>, vector<32x16xbf16>, vector<8x16xf32> -> vector<8x16xf32>
    %c11_i32 = arith.constant 11 : i32
    %141 = arith.addi %7, %c11_i32 : i32
    %142 = vector.broadcast %141 : i32 to vector<8x32xi32>
    %143 = arith.cmpi eq, %6, %142 : vector<8x32xi32>
    %cst_51 = arith.constant 0.000000e+00 : f32
    %144 = vector.broadcast %cst_51 : f32 to vector<8x32xf32>
    %145 = arith.select %143, %3, %144 : vector<8x32xi1>, vector<8x32xf32>
    %cst_52 = arith.constant dense<0.000000e+00> : vector<8xf32>
    %146 = vector.multi_reduction <add>, %145, %cst_52 [1] : vector<8x32xf32> to vector<8xf32>
    %147 = vector.shape_cast %146 : vector<8xf32> to vector<8x1xf32>
    %148 = vector.broadcast %147 : vector<8x1xf32> to vector<8x16xf32>
    %149 = arith.mulf %148, %140 : vector<8x16xf32>
    %150 = arith.addf %138, %149 : vector<8x16xf32>
    %c384 = arith.constant 384 : index
    %c0_53 = arith.constant 0 : index
    %151 = vector.load %arg5[%c384, %c0_53] : memref<1024x16xbf16, #tpu.memory_space<vmem>>, vector<32x16xbf16>
    %cst_54 = arith.constant dense<0.000000e+00> : vector<8x16xf32>
    %152 = tpu.matmul %5, %151, %cst_54 {dimension_numbers = #tpu.dot_dimension_numbers<[1], [0], [0], [1], [0, 0, 1, 1], [], []>} : vector<8x32xbf16>, vector<32x16xbf16>, vector<8x16xf32> -> vector<8x16xf32>
    %c12_i32 = arith.constant 12 : i32
    %153 = arith.addi %7, %c12_i32 : i32
    %154 = vector.broadcast %153 : i32 to vector<8x32xi32>
    %155 = arith.cmpi eq, %6, %154 : vector<8x32xi32>
    %cst_55 = arith.constant 0.000000e+00 : f32
    %156 = vector.broadcast %cst_55 : f32 to vector<8x32xf32>
    %157 = arith.select %155, %3, %156 : vector<8x32xi1>, vector<8x32xf32>
    %cst_56 = arith.constant dense<0.000000e+00> : vector<8xf32>
    %158 = vector.multi_reduction <add>, %157, %cst_56 [1] : vector<8x32xf32> to vector<8xf32>
    %159 = vector.shape_cast %158 : vector<8xf32> to vector<8x1xf32>
    %160 = vector.broadcast %159 : vector<8x1xf32> to vector<8x16xf32>
    %161 = arith.mulf %160, %152 : vector<8x16xf32>
    %162 = arith.addf %150, %161 : vector<8x16xf32>
    %c416 = arith.constant 416 : index
    %c0_57 = arith.constant 0 : index
    %163 = vector.load %arg5[%c416, %c0_57] : memref<1024x16xbf16, #tpu.memory_space<vmem>>, vector<32x16xbf16>
    %cst_58 = arith.constant dense<0.000000e+00> : vector<8x16xf32>
    %164 = tpu.matmul %5, %163, %cst_58 {dimension_numbers = #tpu.dot_dimension_numbers<[1], [0], [0], [1], [0, 0, 1, 1], [], []>} : vector<8x32xbf16>, vector<32x16xbf16>, vector<8x16xf32> -> vector<8x16xf32>
    %c13_i32 = arith.constant 13 : i32
    %165 = arith.addi %7, %c13_i32 : i32
    %166 = vector.broadcast %165 : i32 to vector<8x32xi32>
    %167 = arith.cmpi eq, %6, %166 : vector<8x32xi32>
    %cst_59 = arith.constant 0.000000e+00 : f32
    %168 = vector.broadcast %cst_59 : f32 to vector<8x32xf32>
    %169 = arith.select %167, %3, %168 : vector<8x32xi1>, vector<8x32xf32>
    %cst_60 = arith.constant dense<0.000000e+00> : vector<8xf32>
    %170 = vector.multi_reduction <add>, %169, %cst_60 [1] : vector<8x32xf32> to vector<8xf32>
    %171 = vector.shape_cast %170 : vector<8xf32> to vector<8x1xf32>
    %172 = vector.broadcast %171 : vector<8x1xf32> to vector<8x16xf32>
    %173 = arith.mulf %172, %164 : vector<8x16xf32>
    %174 = arith.addf %162, %173 : vector<8x16xf32>
    %c448 = arith.constant 448 : index
    %c0_61 = arith.constant 0 : index
    %175 = vector.load %arg5[%c448, %c0_61] : memref<1024x16xbf16, #tpu.memory_space<vmem>>, vector<32x16xbf16>
    %cst_62 = arith.constant dense<0.000000e+00> : vector<8x16xf32>
    %176 = tpu.matmul %5, %175, %cst_62 {dimension_numbers = #tpu.dot_dimension_numbers<[1], [0], [0], [1], [0, 0, 1, 1], [], []>} : vector<8x32xbf16>, vector<32x16xbf16>, vector<8x16xf32> -> vector<8x16xf32>
    %c14_i32 = arith.constant 14 : i32
    %177 = arith.addi %7, %c14_i32 : i32
    %178 = vector.broadcast %177 : i32 to vector<8x32xi32>
    %179 = arith.cmpi eq, %6, %178 : vector<8x32xi32>
    %cst_63 = arith.constant 0.000000e+00 : f32
    %180 = vector.broadcast %cst_63 : f32 to vector<8x32xf32>
    %181 = arith.select %179, %3, %180 : vector<8x32xi1>, vector<8x32xf32>
    %cst_64 = arith.constant dense<0.000000e+00> : vector<8xf32>
    %182 = vector.multi_reduction <add>, %181, %cst_64 [1] : vector<8x32xf32> to vector<8xf32>
    %183 = vector.shape_cast %182 : vector<8xf32> to vector<8x1xf32>
    %184 = vector.broadcast %183 : vector<8x1xf32> to vector<8x16xf32>
    %185 = arith.mulf %184, %176 : vector<8x16xf32>
    %186 = arith.addf %174, %185 : vector<8x16xf32>
    %c480 = arith.constant 480 : index
    %c0_65 = arith.constant 0 : index
    %187 = vector.load %arg5[%c480, %c0_65] : memref<1024x16xbf16, #tpu.memory_space<vmem>>, vector<32x16xbf16>
    %cst_66 = arith.constant dense<0.000000e+00> : vector<8x16xf32>
    %188 = tpu.matmul %5, %187, %cst_66 {dimension_numbers = #tpu.dot_dimension_numbers<[1], [0], [0], [1], [0, 0, 1, 1], [], []>} : vector<8x32xbf16>, vector<32x16xbf16>, vector<8x16xf32> -> vector<8x16xf32>
    %c15_i32 = arith.constant 15 : i32
    %189 = arith.addi %7, %c15_i32 : i32
    %190 = vector.broadcast %189 : i32 to vector<8x32xi32>
    %191 = arith.cmpi eq, %6, %190 : vector<8x32xi32>
    %cst_67 = arith.constant 0.000000e+00 : f32
    %192 = vector.broadcast %cst_67 : f32 to vector<8x32xf32>
    %193 = arith.select %191, %3, %192 : vector<8x32xi1>, vector<8x32xf32>
    %cst_68 = arith.constant dense<0.000000e+00> : vector<8xf32>
    %194 = vector.multi_reduction <add>, %193, %cst_68 [1] : vector<8x32xf32> to vector<8xf32>
    %195 = vector.shape_cast %194 : vector<8xf32> to vector<8x1xf32>
    %196 = vector.broadcast %195 : vector<8x1xf32> to vector<8x16xf32>
    %197 = arith.mulf %196, %188 : vector<8x16xf32>
    %198 = arith.addf %186, %197 : vector<8x16xf32>
    %c512 = arith.constant 512 : index
    %c0_69 = arith.constant 0 : index
    %199 = vector.load %arg5[%c512, %c0_69] : memref<1024x16xbf16, #tpu.memory_space<vmem>>, vector<32x16xbf16>
    %cst_70 = arith.constant dense<0.000000e+00> : vector<8x16xf32>
    %200 = tpu.matmul %5, %199, %cst_70 {dimension_numbers = #tpu.dot_dimension_numbers<[1], [0], [0], [1], [0, 0, 1, 1], [], []>} : vector<8x32xbf16>, vector<32x16xbf16>, vector<8x16xf32> -> vector<8x16xf32>
    %c16_i32 = arith.constant 16 : i32
    %201 = arith.addi %7, %c16_i32 : i32
    %202 = vector.broadcast %201 : i32 to vector<8x32xi32>
    %203 = arith.cmpi eq, %6, %202 : vector<8x32xi32>
    %cst_71 = arith.constant 0.000000e+00 : f32
    %204 = vector.broadcast %cst_71 : f32 to vector<8x32xf32>
    %205 = arith.select %203, %3, %204 : vector<8x32xi1>, vector<8x32xf32>
    %cst_72 = arith.constant dense<0.000000e+00> : vector<8xf32>
    %206 = vector.multi_reduction <add>, %205, %cst_72 [1] : vector<8x32xf32> to vector<8xf32>
    %207 = vector.shape_cast %206 : vector<8xf32> to vector<8x1xf32>
    %208 = vector.broadcast %207 : vector<8x1xf32> to vector<8x16xf32>
    %209 = arith.mulf %208, %200 : vector<8x16xf32>
    %210 = arith.addf %198, %209 : vector<8x16xf32>
    %c544 = arith.constant 544 : index
    %c0_73 = arith.constant 0 : index
    %211 = vector.load %arg5[%c544, %c0_73] : memref<1024x16xbf16, #tpu.memory_space<vmem>>, vector<32x16xbf16>
    %cst_74 = arith.constant dense<0.000000e+00> : vector<8x16xf32>
    %212 = tpu.matmul %5, %211, %cst_74 {dimension_numbers = #tpu.dot_dimension_numbers<[1], [0], [0], [1], [0, 0, 1, 1], [], []>} : vector<8x32xbf16>, vector<32x16xbf16>, vector<8x16xf32> -> vector<8x16xf32>
    %c17_i32 = arith.constant 17 : i32
    %213 = arith.addi %7, %c17_i32 : i32
    %214 = vector.broadcast %213 : i32 to vector<8x32xi32>
    %215 = arith.cmpi eq, %6, %214 : vector<8x32xi32>
    %cst_75 = arith.constant 0.000000e+00 : f32
    %216 = vector.broadcast %cst_75 : f32 to vector<8x32xf32>
    %217 = arith.select %215, %3, %216 : vector<8x32xi1>, vector<8x32xf32>
    %cst_76 = arith.constant dense<0.000000e+00> : vector<8xf32>
    %218 = vector.multi_reduction <add>, %217, %cst_76 [1] : vector<8x32xf32> to vector<8xf32>
    %219 = vector.shape_cast %218 : vector<8xf32> to vector<8x1xf32>
    %220 = vector.broadcast %219 : vector<8x1xf32> to vector<8x16xf32>
    %221 = arith.mulf %220, %212 : vector<8x16xf32>
    %222 = arith.addf %210, %221 : vector<8x16xf32>
    %c576 = arith.constant 576 : index
    %c0_77 = arith.constant 0 : index
    %223 = vector.load %arg5[%c576, %c0_77] : memref<1024x16xbf16, #tpu.memory_space<vmem>>, vector<32x16xbf16>
    %cst_78 = arith.constant dense<0.000000e+00> : vector<8x16xf32>
    %224 = tpu.matmul %5, %223, %cst_78 {dimension_numbers = #tpu.dot_dimension_numbers<[1], [0], [0], [1], [0, 0, 1, 1], [], []>} : vector<8x32xbf16>, vector<32x16xbf16>, vector<8x16xf32> -> vector<8x16xf32>
    %c18_i32 = arith.constant 18 : i32
    %225 = arith.addi %7, %c18_i32 : i32
    %226 = vector.broadcast %225 : i32 to vector<8x32xi32>
    %227 = arith.cmpi eq, %6, %226 : vector<8x32xi32>
    %cst_79 = arith.constant 0.000000e+00 : f32
    %228 = vector.broadcast %cst_79 : f32 to vector<8x32xf32>
    %229 = arith.select %227, %3, %228 : vector<8x32xi1>, vector<8x32xf32>
    %cst_80 = arith.constant dense<0.000000e+00> : vector<8xf32>
    %230 = vector.multi_reduction <add>, %229, %cst_80 [1] : vector<8x32xf32> to vector<8xf32>
    %231 = vector.shape_cast %230 : vector<8xf32> to vector<8x1xf32>
    %232 = vector.broadcast %231 : vector<8x1xf32> to vector<8x16xf32>
    %233 = arith.mulf %232, %224 : vector<8x16xf32>
    %234 = arith.addf %222, %233 : vector<8x16xf32>
    %c608 = arith.constant 608 : index
    %c0_81 = arith.constant 0 : index
    %235 = vector.load %arg5[%c608, %c0_81] : memref<1024x16xbf16, #tpu.memory_space<vmem>>, vector<32x16xbf16>
    %cst_82 = arith.constant dense<0.000000e+00> : vector<8x16xf32>
    %236 = tpu.matmul %5, %235, %cst_82 {dimension_numbers = #tpu.dot_dimension_numbers<[1], [0], [0], [1], [0, 0, 1, 1], [], []>} : vector<8x32xbf16>, vector<32x16xbf16>, vector<8x16xf32> -> vector<8x16xf32>
    %c19_i32 = arith.constant 19 : i32
    %237 = arith.addi %7, %c19_i32 : i32
    %238 = vector.broadcast %237 : i32 to vector<8x32xi32>
    %239 = arith.cmpi eq, %6, %238 : vector<8x32xi32>
    %cst_83 = arith.constant 0.000000e+00 : f32
    %240 = vector.broadcast %cst_83 : f32 to vector<8x32xf32>
    %241 = arith.select %239, %3, %240 : vector<8x32xi1>, vector<8x32xf32>
    %cst_84 = arith.constant dense<0.000000e+00> : vector<8xf32>
    %242 = vector.multi_reduction <add>, %241, %cst_84 [1] : vector<8x32xf32> to vector<8xf32>
    %243 = vector.shape_cast %242 : vector<8xf32> to vector<8x1xf32>
    %244 = vector.broadcast %243 : vector<8x1xf32> to vector<8x16xf32>
    %245 = arith.mulf %244, %236 : vector<8x16xf32>
    %246 = arith.addf %234, %245 : vector<8x16xf32>
    %c640 = arith.constant 640 : index
    %c0_85 = arith.constant 0 : index
    %247 = vector.load %arg5[%c640, %c0_85] : memref<1024x16xbf16, #tpu.memory_space<vmem>>, vector<32x16xbf16>
    %cst_86 = arith.constant dense<0.000000e+00> : vector<8x16xf32>
    %248 = tpu.matmul %5, %247, %cst_86 {dimension_numbers = #tpu.dot_dimension_numbers<[1], [0], [0], [1], [0, 0, 1, 1], [], []>} : vector<8x32xbf16>, vector<32x16xbf16>, vector<8x16xf32> -> vector<8x16xf32>
    %c20_i32 = arith.constant 20 : i32
    %249 = arith.addi %7, %c20_i32 : i32
    %250 = vector.broadcast %249 : i32 to vector<8x32xi32>
    %251 = arith.cmpi eq, %6, %250 : vector<8x32xi32>
    %cst_87 = arith.constant 0.000000e+00 : f32
    %252 = vector.broadcast %cst_87 : f32 to vector<8x32xf32>
    %253 = arith.select %251, %3, %252 : vector<8x32xi1>, vector<8x32xf32>
    %cst_88 = arith.constant dense<0.000000e+00> : vector<8xf32>
    %254 = vector.multi_reduction <add>, %253, %cst_88 [1] : vector<8x32xf32> to vector<8xf32>
    %255 = vector.shape_cast %254 : vector<8xf32> to vector<8x1xf32>
    %256 = vector.broadcast %255 : vector<8x1xf32> to vector<8x16xf32>
    %257 = arith.mulf %256, %248 : vector<8x16xf32>
    %258 = arith.addf %246, %257 : vector<8x16xf32>
    %c672 = arith.constant 672 : index
    %c0_89 = arith.constant 0 : index
    %259 = vector.load %arg5[%c672, %c0_89] : memref<1024x16xbf16, #tpu.memory_space<vmem>>, vector<32x16xbf16>
    %cst_90 = arith.constant dense<0.000000e+00> : vector<8x16xf32>
    %260 = tpu.matmul %5, %259, %cst_90 {dimension_numbers = #tpu.dot_dimension_numbers<[1], [0], [0], [1], [0, 0, 1, 1], [], []>} : vector<8x32xbf16>, vector<32x16xbf16>, vector<8x16xf32> -> vector<8x16xf32>
    %c21_i32 = arith.constant 21 : i32
    %261 = arith.addi %7, %c21_i32 : i32
    %262 = vector.broadcast %261 : i32 to vector<8x32xi32>
    %263 = arith.cmpi eq, %6, %262 : vector<8x32xi32>
    %cst_91 = arith.constant 0.000000e+00 : f32
    %264 = vector.broadcast %cst_91 : f32 to vector<8x32xf32>
    %265 = arith.select %263, %3, %264 : vector<8x32xi1>, vector<8x32xf32>
    %cst_92 = arith.constant dense<0.000000e+00> : vector<8xf32>
    %266 = vector.multi_reduction <add>, %265, %cst_92 [1] : vector<8x32xf32> to vector<8xf32>
    %267 = vector.shape_cast %266 : vector<8xf32> to vector<8x1xf32>
    %268 = vector.broadcast %267 : vector<8x1xf32> to vector<8x16xf32>
    %269 = arith.mulf %268, %260 : vector<8x16xf32>
    %270 = arith.addf %258, %269 : vector<8x16xf32>
    %c704 = arith.constant 704 : index
    %c0_93 = arith.constant 0 : index
    %271 = vector.load %arg5[%c704, %c0_93] : memref<1024x16xbf16, #tpu.memory_space<vmem>>, vector<32x16xbf16>
    %cst_94 = arith.constant dense<0.000000e+00> : vector<8x16xf32>
    %272 = tpu.matmul %5, %271, %cst_94 {dimension_numbers = #tpu.dot_dimension_numbers<[1], [0], [0], [1], [0, 0, 1, 1], [], []>} : vector<8x32xbf16>, vector<32x16xbf16>, vector<8x16xf32> -> vector<8x16xf32>
    %c22_i32 = arith.constant 22 : i32
    %273 = arith.addi %7, %c22_i32 : i32
    %274 = vector.broadcast %273 : i32 to vector<8x32xi32>
    %275 = arith.cmpi eq, %6, %274 : vector<8x32xi32>
    %cst_95 = arith.constant 0.000000e+00 : f32
    %276 = vector.broadcast %cst_95 : f32 to vector<8x32xf32>
    %277 = arith.select %275, %3, %276 : vector<8x32xi1>, vector<8x32xf32>
    %cst_96 = arith.constant dense<0.000000e+00> : vector<8xf32>
    %278 = vector.multi_reduction <add>, %277, %cst_96 [1] : vector<8x32xf32> to vector<8xf32>
    %279 = vector.shape_cast %278 : vector<8xf32> to vector<8x1xf32>
    %280 = vector.broadcast %279 : vector<8x1xf32> to vector<8x16xf32>
    %281 = arith.mulf %280, %272 : vector<8x16xf32>
    %282 = arith.addf %270, %281 : vector<8x16xf32>
    %c736 = arith.constant 736 : index
    %c0_97 = arith.constant 0 : index
    %283 = vector.load %arg5[%c736, %c0_97] : memref<1024x16xbf16, #tpu.memory_space<vmem>>, vector<32x16xbf16>
    %cst_98 = arith.constant dense<0.000000e+00> : vector<8x16xf32>
    %284 = tpu.matmul %5, %283, %cst_98 {dimension_numbers = #tpu.dot_dimension_numbers<[1], [0], [0], [1], [0, 0, 1, 1], [], []>} : vector<8x32xbf16>, vector<32x16xbf16>, vector<8x16xf32> -> vector<8x16xf32>
    %c23_i32 = arith.constant 23 : i32
    %285 = arith.addi %7, %c23_i32 : i32
    %286 = vector.broadcast %285 : i32 to vector<8x32xi32>
    %287 = arith.cmpi eq, %6, %286 : vector<8x32xi32>
    %cst_99 = arith.constant 0.000000e+00 : f32
    %288 = vector.broadcast %cst_99 : f32 to vector<8x32xf32>
    %289 = arith.select %287, %3, %288 : vector<8x32xi1>, vector<8x32xf32>
    %cst_100 = arith.constant dense<0.000000e+00> : vector<8xf32>
    %290 = vector.multi_reduction <add>, %289, %cst_100 [1] : vector<8x32xf32> to vector<8xf32>
    %291 = vector.shape_cast %290 : vector<8xf32> to vector<8x1xf32>
    %292 = vector.broadcast %291 : vector<8x1xf32> to vector<8x16xf32>
    %293 = arith.mulf %292, %284 : vector<8x16xf32>
    %294 = arith.addf %282, %293 : vector<8x16xf32>
    %c768 = arith.constant 768 : index
    %c0_101 = arith.constant 0 : index
    %295 = vector.load %arg5[%c768, %c0_101] : memref<1024x16xbf16, #tpu.memory_space<vmem>>, vector<32x16xbf16>
    %cst_102 = arith.constant dense<0.000000e+00> : vector<8x16xf32>
    %296 = tpu.matmul %5, %295, %cst_102 {dimension_numbers = #tpu.dot_dimension_numbers<[1], [0], [0], [1], [0, 0, 1, 1], [], []>} : vector<8x32xbf16>, vector<32x16xbf16>, vector<8x16xf32> -> vector<8x16xf32>
    %c24_i32 = arith.constant 24 : i32
    %297 = arith.addi %7, %c24_i32 : i32
    %298 = vector.broadcast %297 : i32 to vector<8x32xi32>
    %299 = arith.cmpi eq, %6, %298 : vector<8x32xi32>
    %cst_103 = arith.constant 0.000000e+00 : f32
    %300 = vector.broadcast %cst_103 : f32 to vector<8x32xf32>
    %301 = arith.select %299, %3, %300 : vector<8x32xi1>, vector<8x32xf32>
    %cst_104 = arith.constant dense<0.000000e+00> : vector<8xf32>
    %302 = vector.multi_reduction <add>, %301, %cst_104 [1] : vector<8x32xf32> to vector<8xf32>
    %303 = vector.shape_cast %302 : vector<8xf32> to vector<8x1xf32>
    %304 = vector.broadcast %303 : vector<8x1xf32> to vector<8x16xf32>
    %305 = arith.mulf %304, %296 : vector<8x16xf32>
    %306 = arith.addf %294, %305 : vector<8x16xf32>
    %c800 = arith.constant 800 : index
    %c0_105 = arith.constant 0 : index
    %307 = vector.load %arg5[%c800, %c0_105] : memref<1024x16xbf16, #tpu.memory_space<vmem>>, vector<32x16xbf16>
    %cst_106 = arith.constant dense<0.000000e+00> : vector<8x16xf32>
    %308 = tpu.matmul %5, %307, %cst_106 {dimension_numbers = #tpu.dot_dimension_numbers<[1], [0], [0], [1], [0, 0, 1, 1], [], []>} : vector<8x32xbf16>, vector<32x16xbf16>, vector<8x16xf32> -> vector<8x16xf32>
    %c25_i32 = arith.constant 25 : i32
    %309 = arith.addi %7, %c25_i32 : i32
    %310 = vector.broadcast %309 : i32 to vector<8x32xi32>
    %311 = arith.cmpi eq, %6, %310 : vector<8x32xi32>
    %cst_107 = arith.constant 0.000000e+00 : f32
    %312 = vector.broadcast %cst_107 : f32 to vector<8x32xf32>
    %313 = arith.select %311, %3, %312 : vector<8x32xi1>, vector<8x32xf32>
    %cst_108 = arith.constant dense<0.000000e+00> : vector<8xf32>
    %314 = vector.multi_reduction <add>, %313, %cst_108 [1] : vector<8x32xf32> to vector<8xf32>
    %315 = vector.shape_cast %314 : vector<8xf32> to vector<8x1xf32>
    %316 = vector.broadcast %315 : vector<8x1xf32> to vector<8x16xf32>
    %317 = arith.mulf %316, %308 : vector<8x16xf32>
    %318 = arith.addf %306, %317 : vector<8x16xf32>
    %c832 = arith.constant 832 : index
    %c0_109 = arith.constant 0 : index
    %319 = vector.load %arg5[%c832, %c0_109] : memref<1024x16xbf16, #tpu.memory_space<vmem>>, vector<32x16xbf16>
    %cst_110 = arith.constant dense<0.000000e+00> : vector<8x16xf32>
    %320 = tpu.matmul %5, %319, %cst_110 {dimension_numbers = #tpu.dot_dimension_numbers<[1], [0], [0], [1], [0, 0, 1, 1], [], []>} : vector<8x32xbf16>, vector<32x16xbf16>, vector<8x16xf32> -> vector<8x16xf32>
    %c26_i32 = arith.constant 26 : i32
    %321 = arith.addi %7, %c26_i32 : i32
    %322 = vector.broadcast %321 : i32 to vector<8x32xi32>
    %323 = arith.cmpi eq, %6, %322 : vector<8x32xi32>
    %cst_111 = arith.constant 0.000000e+00 : f32
    %324 = vector.broadcast %cst_111 : f32 to vector<8x32xf32>
    %325 = arith.select %323, %3, %324 : vector<8x32xi1>, vector<8x32xf32>
    %cst_112 = arith.constant dense<0.000000e+00> : vector<8xf32>
    %326 = vector.multi_reduction <add>, %325, %cst_112 [1] : vector<8x32xf32> to vector<8xf32>
    %327 = vector.shape_cast %326 : vector<8xf32> to vector<8x1xf32>
    %328 = vector.broadcast %327 : vector<8x1xf32> to vector<8x16xf32>
    %329 = arith.mulf %328, %320 : vector<8x16xf32>
    %330 = arith.addf %318, %329 : vector<8x16xf32>
    %c864 = arith.constant 864 : index
    %c0_113 = arith.constant 0 : index
    %331 = vector.load %arg5[%c864, %c0_113] : memref<1024x16xbf16, #tpu.memory_space<vmem>>, vector<32x16xbf16>
    %cst_114 = arith.constant dense<0.000000e+00> : vector<8x16xf32>
    %332 = tpu.matmul %5, %331, %cst_114 {dimension_numbers = #tpu.dot_dimension_numbers<[1], [0], [0], [1], [0, 0, 1, 1], [], []>} : vector<8x32xbf16>, vector<32x16xbf16>, vector<8x16xf32> -> vector<8x16xf32>
    %c27_i32 = arith.constant 27 : i32
    %333 = arith.addi %7, %c27_i32 : i32
    %334 = vector.broadcast %333 : i32 to vector<8x32xi32>
    %335 = arith.cmpi eq, %6, %334 : vector<8x32xi32>
    %cst_115 = arith.constant 0.000000e+00 : f32
    %336 = vector.broadcast %cst_115 : f32 to vector<8x32xf32>
    %337 = arith.select %335, %3, %336 : vector<8x32xi1>, vector<8x32xf32>
    %cst_116 = arith.constant dense<0.000000e+00> : vector<8xf32>
    %338 = vector.multi_reduction <add>, %337, %cst_116 [1] : vector<8x32xf32> to vector<8xf32>
    %339 = vector.shape_cast %338 : vector<8xf32> to vector<8x1xf32>
    %340 = vector.broadcast %339 : vector<8x1xf32> to vector<8x16xf32>
    %341 = arith.mulf %340, %332 : vector<8x16xf32>
    %342 = arith.addf %330, %341 : vector<8x16xf32>
    %c896 = arith.constant 896 : index
    %c0_117 = arith.constant 0 : index
    %343 = vector.load %arg5[%c896, %c0_117] : memref<1024x16xbf16, #tpu.memory_space<vmem>>, vector<32x16xbf16>
    %cst_118 = arith.constant dense<0.000000e+00> : vector<8x16xf32>
    %344 = tpu.matmul %5, %343, %cst_118 {dimension_numbers = #tpu.dot_dimension_numbers<[1], [0], [0], [1], [0, 0, 1, 1], [], []>} : vector<8x32xbf16>, vector<32x16xbf16>, vector<8x16xf32> -> vector<8x16xf32>
    %c28_i32 = arith.constant 28 : i32
    %345 = arith.addi %7, %c28_i32 : i32
    %346 = vector.broadcast %345 : i32 to vector<8x32xi32>
    %347 = arith.cmpi eq, %6, %346 : vector<8x32xi32>
    %cst_119 = arith.constant 0.000000e+00 : f32
    %348 = vector.broadcast %cst_119 : f32 to vector<8x32xf32>
    %349 = arith.select %347, %3, %348 : vector<8x32xi1>, vector<8x32xf32>
    %cst_120 = arith.constant dense<0.000000e+00> : vector<8xf32>
    %350 = vector.multi_reduction <add>, %349, %cst_120 [1] : vector<8x32xf32> to vector<8xf32>
    %351 = vector.shape_cast %350 : vector<8xf32> to vector<8x1xf32>
    %352 = vector.broadcast %351 : vector<8x1xf32> to vector<8x16xf32>
    %353 = arith.mulf %352, %344 : vector<8x16xf32>
    %354 = arith.addf %342, %353 : vector<8x16xf32>
    %c928 = arith.constant 928 : index
    %c0_121 = arith.constant 0 : index
    %355 = vector.load %arg5[%c928, %c0_121] : memref<1024x16xbf16, #tpu.memory_space<vmem>>, vector<32x16xbf16>
    %cst_122 = arith.constant dense<0.000000e+00> : vector<8x16xf32>
    %356 = tpu.matmul %5, %355, %cst_122 {dimension_numbers = #tpu.dot_dimension_numbers<[1], [0], [0], [1], [0, 0, 1, 1], [], []>} : vector<8x32xbf16>, vector<32x16xbf16>, vector<8x16xf32> -> vector<8x16xf32>
    %c29_i32 = arith.constant 29 : i32
    %357 = arith.addi %7, %c29_i32 : i32
    %358 = vector.broadcast %357 : i32 to vector<8x32xi32>
    %359 = arith.cmpi eq, %6, %358 : vector<8x32xi32>
    %cst_123 = arith.constant 0.000000e+00 : f32
    %360 = vector.broadcast %cst_123 : f32 to vector<8x32xf32>
    %361 = arith.select %359, %3, %360 : vector<8x32xi1>, vector<8x32xf32>
    %cst_124 = arith.constant dense<0.000000e+00> : vector<8xf32>
    %362 = vector.multi_reduction <add>, %361, %cst_124 [1] : vector<8x32xf32> to vector<8xf32>
    %363 = vector.shape_cast %362 : vector<8xf32> to vector<8x1xf32>
    %364 = vector.broadcast %363 : vector<8x1xf32> to vector<8x16xf32>
    %365 = arith.mulf %364, %356 : vector<8x16xf32>
    %366 = arith.addf %354, %365 : vector<8x16xf32>
    %c960 = arith.constant 960 : index
    %c0_125 = arith.constant 0 : index
    %367 = vector.load %arg5[%c960, %c0_125] : memref<1024x16xbf16, #tpu.memory_space<vmem>>, vector<32x16xbf16>
    %cst_126 = arith.constant dense<0.000000e+00> : vector<8x16xf32>
    %368 = tpu.matmul %5, %367, %cst_126 {dimension_numbers = #tpu.dot_dimension_numbers<[1], [0], [0], [1], [0, 0, 1, 1], [], []>} : vector<8x32xbf16>, vector<32x16xbf16>, vector<8x16xf32> -> vector<8x16xf32>
    %c30_i32 = arith.constant 30 : i32
    %369 = arith.addi %7, %c30_i32 : i32
    %370 = vector.broadcast %369 : i32 to vector<8x32xi32>
    %371 = arith.cmpi eq, %6, %370 : vector<8x32xi32>
    %cst_127 = arith.constant 0.000000e+00 : f32
    %372 = vector.broadcast %cst_127 : f32 to vector<8x32xf32>
    %373 = arith.select %371, %3, %372 : vector<8x32xi1>, vector<8x32xf32>
    %cst_128 = arith.constant dense<0.000000e+00> : vector<8xf32>
    %374 = vector.multi_reduction <add>, %373, %cst_128 [1] : vector<8x32xf32> to vector<8xf32>
    %375 = vector.shape_cast %374 : vector<8xf32> to vector<8x1xf32>
    %376 = vector.broadcast %375 : vector<8x1xf32> to vector<8x16xf32>
    %377 = arith.mulf %376, %368 : vector<8x16xf32>
    %378 = arith.addf %366, %377 : vector<8x16xf32>
    %c992 = arith.constant 992 : index
    %c0_129 = arith.constant 0 : index
    %379 = vector.load %arg5[%c992, %c0_129] : memref<1024x16xbf16, #tpu.memory_space<vmem>>, vector<32x16xbf16>
    %cst_130 = arith.constant dense<0.000000e+00> : vector<8x16xf32>
    %380 = tpu.matmul %5, %379, %cst_130 {dimension_numbers = #tpu.dot_dimension_numbers<[1], [0], [0], [1], [0, 0, 1, 1], [], []>} : vector<8x32xbf16>, vector<32x16xbf16>, vector<8x16xf32> -> vector<8x16xf32>
    %c31_i32 = arith.constant 31 : i32
    %381 = arith.addi %7, %c31_i32 : i32
    %382 = vector.broadcast %381 : i32 to vector<8x32xi32>
    %383 = arith.cmpi eq, %6, %382 : vector<8x32xi32>
    %cst_131 = arith.constant 0.000000e+00 : f32
    %384 = vector.broadcast %cst_131 : f32 to vector<8x32xf32>
    %385 = arith.select %383, %3, %384 : vector<8x32xi1>, vector<8x32xf32>
    %cst_132 = arith.constant dense<0.000000e+00> : vector<8xf32>
    %386 = vector.multi_reduction <add>, %385, %cst_132 [1] : vector<8x32xf32> to vector<8xf32>
    %387 = vector.shape_cast %386 : vector<8xf32> to vector<8x1xf32>
    %388 = vector.broadcast %387 : vector<8x1xf32> to vector<8x16xf32>
    %389 = arith.mulf %388, %380 : vector<8x16xf32>
    %390 = arith.addf %378, %389 : vector<8x16xf32>
    %c0_133 = arith.constant 0 : index
    %c0_134 = arith.constant 0 : index
    %391 = vector.load %arg8[%c0_133, %c0_134] : memref<8x16xf32, #tpu.memory_space<vmem>>, vector<8x16xf32>
    %392 = arith.addf %391, %390 : vector<8x16xf32>
    %c0_135 = arith.constant 0 : index
    %c0_136 = arith.constant 0 : index
    %393 = vector.load %arg8[%c0_135, %c0_136] : memref<8x16xf32, #tpu.memory_space<vmem>>, vector<8x16xf32>
    tpu.vector_store %arg8[%c0_135, %c0_136], %392 {strides = array<i32>} : memref<8x16xf32, #tpu.memory_space<vmem>>, vector<8x16xf32>,
    %c0_i32_137 = arith.constant 0 : i32
    %394 = arith.cmpi eq, %arg2, %c0_i32_137 : i32
    %395 = arith.extui %394 : i1 to i32
    %c0_i32_138 = arith.constant 0 : i32
    %396 = arith.cmpi ne, %395, %c0_i32_138 : i32
    scf.if %396 {
      %c0_139 = arith.constant 0 : index
      %c0_140 = arith.constant 0 : index
      %397 = vector.load %arg8[%c0_139, %c0_140] : memref<8x16xf32, #tpu.memory_space<vmem>>, vector<8x16xf32>
      %c0_141 = arith.constant 0 : index
      %c0_142 = arith.constant 0 : index
      %398 = vector.load %arg6[%c0_141, %c0_142] : memref<1x16xf32, #tpu.memory_space<vmem>>, vector<1x16xf32>
      %399 = vector.broadcast %398 : vector<1x16xf32> to vector<8x16xf32>
      %400 = arith.addf %397, %399 : vector<8x16xf32>
      %c0_143 = arith.constant 0 : index
      %c0_144 = arith.constant 0 : index
      %401 = vector.load %arg7[%c0_143, %c0_144] : memref<8x16xf32, #tpu.memory_space<vmem>>, vector<8x16xf32>
      tpu.vector_store %arg7[%c0_143, %c0_144], %400 {strides = array<i32>} : memref<8x16xf32, #tpu.memory_space<vmem>>, vector<8x16xf32>,
    } else {
    }
    return
  }
  func.func @transform_0(%arg0: i32, %arg1: i32, %arg2: i32) -> (i32, i32) {
    %c0_i32 = arith.constant 0 : i32
    %c0_i32_0 = arith.constant 0 : i32
    return %arg0, %c0_i32 : i32, i32
  }
  func.func @transform_1(%arg0: i32, %arg1: i32, %arg2: i32) -> (i32, i32) {
    %c0_i32 = arith.constant 0 : i32
    %c0_i32_0 = arith.constant 0 : i32
    return %arg0, %c0_i32 : i32, i32
  }
  func.func @transform_2(%arg0: i32, %arg1: i32, %arg2: i32) -> (i32, i32) {
    %c0_i32 = arith.constant 0 : i32
    return %arg2, %arg1 : i32, i32
  }
  func.func @transform_3(%arg0: i32, %arg1: i32, %arg2: i32) -> (i32, i32) {
    %c0_i32 = arith.constant 0 : i32
    %c0_i32_0 = arith.constant 0 : i32
    return %c0_i32, %arg1 : i32, i32
  }
  func.func @transform_4(%arg0: i32, %arg1: i32, %arg2: i32) -> (i32, i32) {
    %c0_i32 = arith.constant 0 : i32
    return %arg0, %arg1 : i32, i32
  }
}

</mosaic_0001>

<bundles_post_ra>
// kernel: bilinear_forward.1
= control target key start
LH: loop header
LB: loop body
LE: loop exit
PB: predicated region body
PF: predicated region fallthrough
CT: control target
= control target key end

     0   :  { %v2684_v1 = vmov 0.0   ;;  %vm2685_vm0 = vmmov 0   ;;  %vm47_vm1 = vcmask 261120   ;;  %v28_v19 = vlaneseq  ;;  %s3273_s0 = inlined_call_operand.vmem [shape: f32[8,32], index: 0, kind: input, shape index: {}]   ;;  %s3274_s1 = inlined_call_operand.vmem [shape: f32[8,32], index: 1, kind: input, shape index: {}]   ;;  %s3275_s2 = inlined_call_operand.vmem [shape: bf16[1024,16], index: 2, kind: input, shape index: {}]   ;;  %s3276_s3 = inlined_call_operand.vmem [shape: f32[1,16], index: 3, kind: input, shape index: {}]   ;;  %s3277_s4 = inlined_call_operand.hbm [shape: f32[8,16], index: 4, kind: output, shape index: {}]  }
   0x1   :  { %v2596_v0 = vld [vmem:[%s3275_s2] sm:$0xff]   ;;  %2337 = vmatprep.subr.bf16.mxu0 %v2684_v1  ;;  %2345 = vmatprep.subr.bf16.mxu1 %v2684_v1  ;;  %v2597_v2 = vld [vmem:[%s3275_s2 + $0x10] sm:$0xff]   ;;  %v2598_v3 = vld [vmem:[%s3275_s2 + $0x8] sm:$0xff]  }
   0x2   :  { %2338 = vmatpush3.bf16.msra.mxu0 %v2596_v0  ;;  %2341 = vmatprep.mubr.msk.bf16.mxu0 %vm2685_vm0, %v2684_v1  ;;  %v2599_v4 = vld [vmem:[%s3275_s2 + $0x18] sm:$0xff]   ;;  %v26_v5 = vld [vmem:[%s3274_s1] sm:$0xff]  ;;  %v2601_v8 = vld [vmem:[%s3275_s2 + $0x30] sm:$0xff]   ;;  %v2817_v22 = vand.u32 127, %v28_v19 }
   0x3   :  { %2346 = vmatpush3.bf16.msra.mxu1 %v2597_v2  ;;  %2339 = vmatprep.subr.bf16.mxu0 %v2684_v1  ;;  %v2735_v6 = vpack.c.bf16 %v26_v5, %v26_v5  ;;  %v2600_v7 = vld [vmem:[%s3275_s2 + $0x20] sm:$0xff]   ;;  %v2602_v9 = vld [vmem:[%s3275_s2 + $0x28] sm:$0xff]   ;;  %v2603_v10 = vld [vmem:[%s3275_s2 + $0x38] sm:$0xff]  }
   0x4   :  { %2347 = vmatprep.subr.bf16.mxu1 %v2684_v1  ;;  %2349 = vmatprep.mubr.msk.bf16.mxu1 %vm2685_vm0, %v2684_v1  ;;  %v2604_v11 = vld [vmem:[%s3275_s2 + $0x40] sm:$0xff]   ;;  %v2605_v12 = vld [vmem:[%s3275_s2 + $0x50] sm:$0xff]   ;;  %v2606_v13 = vld [vmem:[%s3275_s2 + $0x48] sm:$0xff]   ;;  %vm92_vm2 = vcmp.eq.s32.totalorder %v2817_v22, 0  ;;  %vm156_vm3 = vcmp.eq.s32.totalorder %v2817_v22, 1  ;;  %vm221_vm4 = vcmp.eq.s32.totalorder %v2817_v22, 2 }
   0x5   :  { %v2607_v14 = vld [vmem:[%s3275_s2 + $0x58] sm:$0xff]   ;;  %v2608_v15 = vld [vmem:[%s3275_s2 + $0x60] sm:$0xff]   ;;  %v2609_v16 = vld [vmem:[%s3275_s2 + $0x70] sm:$0xff]   ;;  %vm286_vm5 = vcmp.eq.s32.totalorder %v2817_v22, 3  ;;  %vm351_vm6 = vcmp.eq.s32.totalorder %v2817_v22, 4  ;;  %vm416_vm7 = vcmp.eq.s32.totalorder %v2817_v22, 5 }
   0x6   :  { %2340 = vmatpush3.bf16.msra.mxu0 %v2598_v3  ;;  %v2610_v17 = vld [vmem:[%s3275_s2 + $0x68] sm:$0xff]   ;;  %v2611_v18 = vld [vmem:[%s3275_s2 + $0x78] sm:$0xff]   ;;  %v2612_v20 = vld [vmem:[%s3275_s2 + $0x80] sm:$0xff]   ;;  %vm481_vm8 = vcmp.eq.s32.totalorder %v2817_v22, 6  ;;  %vm546_vm9 = vcmp.eq.s32.totalorder %v2817_v22, 7  ;;  %vm611_vm10 = vcmp.eq.s32.totalorder %v2817_v22, 8 }
   0x7   :  { %2348 = vmatpush3.bf16.msra.mxu1 %v2599_v4  ;;  %2353 = vmatprep.subr.bf16.mxu0 %v2684_v1  ;;  %v2613_v21 = vld [vmem:[%s3275_s2 + $0x90] sm:$0xff]   ;;  %v2614_v23 = vld [vmem:[%s3275_s2 + $0x88] sm:$0xff]   ;;  %v2615_v24 = vld [vmem:[%s3275_s2 + $0x98] sm:$0xff]   ;;  %vm676_vm11 = vcmp.eq.s32.totalorder %v2817_v22, 9  ;;  %vm741_vm12 = vcmp.eq.s32.totalorder %v2817_v22, 10  ;;  %vm806_vm13 = vcmp.eq.s32.totalorder %v2817_v22, 11 }
   0x8   :  { %2361 = vmatprep.subr.bf16.mxu1 %v2684_v1  ;;  %v2616_v25 = vld [vmem:[%s3275_s2 + $0xa0] sm:$0xff]   ;;  %v2617_v27 = vld [vmem:[%s3275_s2 + $0xb0] sm:$0xff]   ;;  %v2618_v31 = vld [vmem:[%s3275_s2 + $0xa8] sm:$0xff]   ;;  %vm871_vm14 = vcmp.eq.s32.totalorder %v2817_v22, 12 }
   0x9   :  { %2342 = vmatmul.mubr.msk.bf16.vlgmr.msra.gmra.mrb[0].mxu0 %vm47_vm1, %v2735_v6  ;;  %v2843_v26 = vld [vmem:[%s3273_s0] sm:$0xff]  ;;  %v2619_v34 = vld [vmem:[%s3275_s2 + $0xb8] sm:$0xff]   ;;  %v2621_v38 = vld [vmem:[%s3275_s2 + $0xd0] sm:$0xff]  }
   0xa   :  { %2350 = vmatmul.mubr.msk.bf16.vlgmr.msra.gmra.mrb[0].mxu1 %vm47_vm1, %v2735_v6  ;;  %2354 = vmatpush3.bf16.msra.mxu0 %v2600_v7  ;;  %v93_v28 = vsel %vm92_vm2, %v2843_v26, 0.0  ;;  %v157_v30 = vsel %vm156_vm3, %v2843_v26, 0.0  ;;  %v222_v33 = vsel %vm221_vm4, %v2843_v26, 0.0  ;;  %v2620_v36 = vld [vmem:[%s3275_s2 + $0xc0] sm:$0xff]   ;;  %v287_v37 = vsel %vm286_vm5, %v2843_v26, 0.0  ;;  %v2622_v40 = vld [vmem:[%s3275_s2 + $0xc8] sm:$0xff]  }
   0xb   :  { %2362 = vmatpush3.bf16.msra.mxu1 %v2601_v8  ;;  %2355 = vmatprep.subr.bf16.mxu0 %v2684_v1  ;;  %v94_v29 = vsel %vm47_vm1, %v93_v28, 0.0  ;;  %v158_v32 = vsel %vm47_vm1, %v157_v30, 0.0  ;;  %v223_v35 = vsel %vm47_vm1, %v222_v33, 0.0  ;;  %v352_v39 = vsel %vm351_vm6, %v2843_v26, 0.0  ;;  %v2623_v44 = vld [vmem:[%s3275_s2 + $0xd8] sm:$0xff]   ;;  %v2624_v46 = vld [vmem:[%s3275_s2 + $0xe0] sm:$0xff]  }
   0xc   :  { %2363 = vmatprep.subr.bf16.mxu1 %v2684_v1  ;;  %2357 = vmatprep.mubr.msk.bf16.mxu0 %vm2685_vm0, %v2684_v1  ;;  %v353_v41 = vsel %vm47_vm1, %v352_v39, 0.0  ;;  %v288_v42 = vsel %vm47_vm1, %v287_v37, 0.0  ;;  %v417_v43 = vsel %vm416_vm7, %v2843_v26, 0.0  ;;  %v482_v45 = vsel %vm481_vm8, %v2843_v26, 0.0  ;;  %v2625_v50 = vld [vmem:[%s3275_s2 + $0xf0] sm:$0xff]   ;;  %v2626_v51 = vld [vmem:[%s3275_s2 + $0xe8] sm:$0xff]  }
   0xd   :  { %2365 = vmatprep.mubr.msk.bf16.mxu1 %vm2685_vm0, %v2684_v1  ;;  %95 = vadd.xlane.f32.xlu0 %v94_v29  ;;  %v483_v47 = vsel %vm47_vm1, %v482_v45, 0.0  ;;  %v418_v48 = vsel %vm47_vm1, %v417_v43, 0.0  ;;  %v547_v49 = vsel %vm546_vm9, %v2843_v26, 0.0  ;;  %v612_v52 = vsel %vm611_vm10, %v2843_v26, 0.0  ;;  %v2627_v55 = vld [vmem:[%s3275_s2 + $0xf8] sm:$0xff]   ;;  %v2628_v57 = vld [vmem:[%s3275_s2 + $0x100] sm:$0xff]  }
   0xe   :  { %2356 = vmatpush3.bf16.msra.mxu0 %v2602_v9  ;;  %224 = vadd.xlane.f32.xlu1 %v223_v35  ;;  %v548_v53 = vsel %vm47_vm1, %v547_v49, 0.0  ;;  %v677_v54 = vsel %vm676_vm11, %v2843_v26, 0.0  ;;  %v613_v56 = vsel %vm47_vm1, %v612_v52, 0.0  ;;  %v2629_v59 = vld [vmem:[%s3275_s2 + $0x110] sm:$0xff]   ;;  %v742_v60 = vsel %vm741_vm12, %v2843_v26, 0.0 }
   0xf   :  { %2364 = vmatpush3.bf16.msra.mxu1 %v2603_v10  ;;  %2369 = vmatprep.subr.bf16.mxu0 %v2684_v1  ;;  %v678_v58 = vsel %vm47_vm1, %v677_v54, 0.0  ;;  %v807_v61 = vsel %vm806_vm13, %v2843_v26, 0.0 }
  0x10   :  { %2377 = vmatprep.subr.bf16.mxu1 %v2684_v1 }
  0x11   :  { %2358 = vmatmul.mubr.msk.bf16.vlgmr.msra.gmra.mrb[4].mxu0 %vm47_vm1, %v2735_v6  ;;  %159 = vadd.xlane.f32.xlu0 %v158_v32 }
  0x12   :  { %2366 = vmatmul.mubr.msk.bf16.vlgmr.msra.gmra.mrb[4].mxu1 %vm47_vm1, %v2735_v6  ;;  %2370 = vmatpush3.bf16.msra.mxu0 %v2604_v11 }
  0x13   :  { %2378 = vmatpush3.bf16.msra.mxu1 %v2605_v12  ;;  %2371 = vmatprep.subr.bf16.mxu0 %v2684_v1 }
  0x14   :  { %2379 = vmatprep.subr.bf16.mxu1 %v2684_v1  ;;  %2373 = vmatprep.mubr.msk.bf16.mxu0 %vm2685_vm0, %v2684_v1 }
  0x15   :  { %2381 = vmatprep.mubr.msk.bf16.mxu1 %vm2685_vm0, %v2684_v1  ;;  %354 = vadd.xlane.f32.xlu0 %v353_v41 }
  0x16   :  { %2372 = vmatpush3.bf16.msra.mxu0 %v2606_v13  ;;  %289 = vadd.xlane.f32.xlu1 %v288_v42 }
  0x17   :  { %2380 = vmatpush3.bf16.msra.mxu1 %v2607_v14  ;;  %2385 = vmatprep.subr.bf16.mxu0 %v2684_v1 }
  0x18   :  { %2393 = vmatprep.subr.bf16.mxu1 %v2684_v1 }
  0x19   :  { %2374 = vmatmul.mubr.msk.bf16.vlgmr.msra.gmra.mrb[8].mxu0 %vm47_vm1, %v2735_v6  ;;  %484 = vadd.xlane.f32.xlu0 %v483_v47 }
  0x1a   :  { %2382 = vmatmul.mubr.msk.bf16.vlgmr.msra.gmra.mrb[8].mxu1 %vm47_vm1, %v2735_v6  ;;  %2386 = vmatpush3.bf16.msra.mxu0 %v2608_v15 }
  0x1b   :  { %2394 = vmatpush3.bf16.msra.mxu1 %v2609_v16  ;;  %2387 = vmatprep.subr.bf16.mxu0 %v2684_v1 }
  0x1c   :  { %2395 = vmatprep.subr.bf16.mxu1 %v2684_v1  ;;  %2389 = vmatprep.mubr.msk.bf16.mxu0 %vm2685_vm0, %v2684_v1 }
  0x1d   :  { %2397 = vmatprep.mubr.msk.bf16.mxu1 %vm2685_vm0, %v2684_v1  ;;  %419 = vadd.xlane.f32.xlu1 %v418_v48 }
  0x1e   :  { %2388 = vmatpush3.bf16.msra.mxu0 %v2610_v17  ;;  %614 = vadd.xlane.f32.xlu0 %v613_v56 }
  0x1f   :  { %2396 = vmatpush3.bf16.msra.mxu1 %v2611_v18  ;;  %2401 = vmatprep.subr.bf16.mxu0 %v2684_v1 }
  0x20   :  { %2409 = vmatprep.subr.bf16.mxu1 %v2684_v1 }
  0x21   :  { %2390 = vmatmul.mubr.msk.bf16.vlgmr.msra.gmra.mrb[12].mxu0 %vm47_vm1, %v2735_v6  ;;  %549 = vadd.xlane.f32.xlu1 %v548_v53 }
  0x22   :  { %2398 = vmatmul.mubr.msk.bf16.vlgmr.msra.gmra.mrb[12].mxu1 %vm47_vm1, %v2735_v6  ;;  %2402 = vmatpush3.bf16.msra.mxu0 %v2612_v20 }
  0x23   :  { %2410 = vmatpush3.bf16.msra.mxu1 %v2613_v21  ;;  %2403 = vmatprep.subr.bf16.mxu0 %v2684_v1 }
  0x24   :  { %2411 = vmatprep.subr.bf16.mxu1 %v2684_v1  ;;  %2405 = vmatprep.mubr.msk.bf16.mxu0 %vm2685_vm0, %v2684_v1 }
  0x25   :  { %2413 = vmatprep.mubr.msk.bf16.mxu1 %vm2685_vm0, %v2684_v1  ;;  %679 = vadd.xlane.f32.xlu1 %v678_v58 }
  0x26   :  { %2404 = vmatpush3.bf16.msra.mxu0 %v2614_v23 }
  0x27   :  { %2412 = vmatpush3.bf16.msra.mxu1 %v2615_v24  ;;  %2417 = vmatprep.subr.bf16.mxu0 %v2684_v1 }
  0x28   :  { %2425 = vmatprep.subr.bf16.mxu1 %v2684_v1 }
  0x29   :  { %2406 = vmatmul.mubr.msk.bf16.vlgmr.msra.gmra.mrb[16].mxu0 %vm47_vm1, %v2735_v6 }
  0x2a   :  { %2414 = vmatmul.mubr.msk.bf16.vlgmr.msra.gmra.mrb[16].mxu1 %vm47_vm1, %v2735_v6  ;;  %2418 = vmatpush3.bf16.msra.mxu0 %v2616_v25 }
  0x2b   :  { %2426 = vmatpush3.bf16.msra.mxu1 %v2617_v27  ;;  %2419 = vmatprep.subr.bf16.mxu0 %v2684_v1 }
  0x2c   :  { %2427 = vmatprep.subr.bf16.mxu1 %v2684_v1  ;;  %2421 = vmatprep.mubr.msk.bf16.mxu0 %vm2685_vm0, %v2684_v1 }
  0x2d   :  { %2429 = vmatprep.mubr.msk.bf16.mxu1 %vm2685_vm0, %v2684_v1 }
  0x2e   :  { %2420 = vmatpush3.bf16.msra.mxu0 %v2618_v31 }
  0x2f   :  { %2428 = vmatpush3.bf16.msra.mxu1 %v2619_v34  ;;  %2433 = vmatprep.subr.bf16.mxu0 %v2684_v1 }
  0x30   :  { %2441 = vmatprep.subr.bf16.mxu1 %v2684_v1 }
  0x31   :  { %2422 = vmatmul.mubr.msk.bf16.vlgmr.msra.gmra.mrb[20].mxu0 %vm47_vm1, %v2735_v6 }
  0x32   :  { %2430 = vmatmul.mubr.msk.bf16.vlgmr.msra.gmra.mrb[20].mxu1 %vm47_vm1, %v2735_v6  ;;  %2434 = vmatpush3.bf16.msra.mxu0 %v2620_v36 }
  0x33   :  { %2442 = vmatpush3.bf16.msra.mxu1 %v2621_v38  ;;  %2435 = vmatprep.subr.bf16.mxu0 %v2684_v1 }
  0x34   :  { %2443 = vmatprep.subr.bf16.mxu1 %v2684_v1  ;;  %2437 = vmatprep.mubr.msk.bf16.mxu0 %vm2685_vm0, %v2684_v1 }
  0x35   :  { %2445 = vmatprep.mubr.msk.bf16.mxu1 %vm2685_vm0, %v2684_v1 }
  0x36   :  { %2436 = vmatpush3.bf16.msra.mxu0 %v2622_v40 }
  0x37   :  { %2444 = vmatpush3.bf16.msra.mxu1 %v2623_v44  ;;  %2449 = vmatprep.subr.bf16.mxu0 %v2684_v1 }
  0x38   :  { %2457 = vmatprep.subr.bf16.mxu1 %v2684_v1 }
  0x39   :  { %2438 = vmatmul.mubr.msk.bf16.vlgmr.msra.gmra.mrb[24].mxu0 %vm47_vm1, %v2735_v6 }
  0x3a   :  { %2446 = vmatmul.mubr.msk.bf16.vlgmr.msra.gmra.mrb[24].mxu1 %vm47_vm1, %v2735_v6  ;;  %2450 = vmatpush3.bf16.msra.mxu0 %v2624_v46 }
  0x3b   :  { %2458 = vmatpush3.bf16.msra.mxu1 %v2625_v50  ;;  %2451 = vmatprep.subr.bf16.mxu0 %v2684_v1 }
  0x3c   :  { %2459 = vmatprep.subr.bf16.mxu1 %v2684_v1  ;;  %2453 = vmatprep.mubr.msk.bf16.mxu0 %vm2685_vm0, %v2684_v1 }
  0x3d   :  { %2461 = vmatprep.mubr.msk.bf16.mxu1 %vm2685_vm0, %v2684_v1 }
  0x3e   :  { %2452 = vmatpush3.bf16.msra.mxu0 %v2626_v51 }
  0x3f   :  { %2460 = vmatpush3.bf16.msra.mxu1 %v2627_v55  ;;  %2465 = vmatprep.subr.bf16.mxu0 %v2684_v1 }
  0x40   :  { %2473 = vmatprep.subr.bf16.mxu1 %v2684_v1 }
  0x41   :  { %2454 = vmatmul.mubr.msk.bf16.vlgmr.msra.gmra.mrb[28].mxu0 %vm47_vm1, %v2735_v6 }
  0x42   :  { %9 = vsyncpa [#allocation4], 0  ;;  %2462 = vmatmul.mubr.msk.bf16.vlgmr.msra.gmra.mrb[28].mxu1 %vm47_vm1, %v2735_v6  ;;  %2466 = vmatpush3.bf16.msra.mxu0 %v2628_v57  ;;  %v2630_v62 = vld [vmem:[%s3275_s2 + $0x108] sm:$0xff]   ;;  %v743_v63 = vsel %vm47_vm1, %v742_v60, 0.0  ;;  %vm1651_vm15 = vcmp.eq.s32.totalorder %v2817_v22, 24  ;;  %v2631_v0 = vld [vmem:[%s3275_s2 + $0x118] sm:$0xff]  }
  0x43   :  { %2474 = vmatpush3.bf16.msra.mxu1 %v2629_v59  ;;  %2467 = vmatprep.subr.bf16.mxu0 %v2684_v1  ;;  %v808_v2 = vsel %vm47_vm1, %v807_v61, 0.0  ;;  %v872_v3 = vsel %vm871_vm14, %v2843_v26, 0.0  ;;  %vm1716_vm2 = vcmp.eq.s32.totalorder %v2817_v22, 25  ;;  %vm1781_vm3 = vcmp.eq.s32.totalorder %v2817_v22, 26  ;;  %v2632_v5 = vld [vmem:[%s3275_s2 + $0x120] sm:$0xff]   ;;  %v2633_v10 = vld [vmem:[%s3275_s2 + $0x130] sm:$0xff]  }
  0x44   :  { %2475 = vmatprep.subr.bf16.mxu1 %v2684_v1  ;;  %2469 = vmatprep.mubr.msk.bf16.mxu0 %vm2685_vm0, %v2684_v1  ;;  %vm936_vm4 = vcmp.eq.s32.totalorder %v2817_v22, 13  ;;  %vm1846_vm5 = vcmp.eq.s32.totalorder %v2817_v22, 27  ;;  %vm1911_vm6 = vcmp.eq.s32.totalorder %v2817_v22, 28  ;;  %vm1001_vm7 = vcmp.eq.s32.totalorder %v2817_v22, 14  ;;  %v2634_v18 = vld [vmem:[%s3275_s2 + $0x128] sm:$0xff]   ;;  %v2635_v20 = vld [vmem:[%s3275_s2 + $0x138] sm:$0xff]  }
  0x45   :  { %2477 = vmatprep.mubr.msk.bf16.mxu1 %vm2685_vm0, %v2684_v1  ;;  %744 = vadd.xlane.f32.xlu0 %v743_v63  ;;  %v2992_v4 = vsel %vm1651_vm15, %v2843_v26, 0.0  ;;  %vm1976_vm8 = vcmp.eq.s32.totalorder %v2817_v22, 29  ;;  %vm2041_vm9 = vcmp.eq.s32.totalorder %v2817_v22, 30  ;;  %v873_v7 = vsel %vm47_vm1, %v872_v3, 0.0  ;;  %v2636_v24 = vld [vmem:[%s3275_s2 + $0x140] sm:$0xff]   ;;  %v2637_v27 = vld [vmem:[%s3275_s2 + $0x150] sm:$0xff]  }
  0x46   :  { %2468 = vmatpush3.bf16.msra.mxu0 %v2630_v62  ;;  %809 = vadd.xlane.f32.xlu1 %v808_v2  ;;  %v3003_v8 = vsel %vm1716_vm2, %v2843_v26, 0.0  ;;  %v3008_v9 = vsel %vm1781_vm3, %v2843_v26, 0.0  ;;  %vm2106_vm10 = vcmp.eq.s32.totalorder %v2817_v22, 31  ;;  %v937_v11 = vsel %vm936_vm4, %v2843_v26, 0.0  ;;  %v2638_v30 = vld [vmem:[%s3275_s2 + $0x148] sm:$0xff]   ;;  %v2639_v32 = vld [vmem:[%s3275_s2 + $0x158] sm:$0xff]  }
  0x47   :  { %2476 = vmatpush3.bf16.msra.mxu1 %v2631_v0  ;;  %2481 = vmatprep.subr.bf16.mxu0 %v2684_v1  ;;  %v3021_v12 = vsel %vm1846_vm5, %v2843_v26, 0.0  ;;  %v3026_v13 = vsel %vm1911_vm6, %v2843_v26, 0.0  ;;  %v1002_v14 = vsel %vm1001_vm7, %v2843_v26, 0.0  ;;  %vm1066_vm11 = vcmp.eq.s32.totalorder %v2817_v22, 15  ;;  %v2640_v35 = vld [vmem:[%s3275_s2 + $0x160] sm:$0xff]   ;;  %v2641_v37 = vld [vmem:[%s3275_s2 + $0x170] sm:$0xff]  }
  0x48   :  { %2489 = vmatprep.subr.bf16.mxu1 %v2684_v1  ;;  %v3036_v15 = vsel %vm1976_vm8, %v2843_v26, 0.0  ;;  %v3041_v16 = vsel %vm2041_vm9, %v2843_v26, 0.0  ;;  %v3046_v17 = vsel %vm2106_vm10, %v2843_v26, 0.0  ;;  %v938_v19 = vsel %vm47_vm1, %v937_v11, 0.0  ;;  %v2642_v40 = vld [vmem:[%s3275_s2 + $0x168] sm:$0xff]   ;;  %v2643_v42 = vld [vmem:[%s3275_s2 + $0x178] sm:$0xff]  }
  0x49   :  { %2470 = vmatmul.mubr.msk.bf16.vlgmr.msra.gmra.mrb[32].mxu0 %vm47_vm1, %v2735_v6  ;;  %874 = vadd.xlane.f32.xlu0 %v873_v7  ;;  %v1003_v21 = vsel %vm47_vm1, %v1002_v14, 0.0  ;;  %v1067_v23 = vsel %vm1066_vm11, %v2843_v26, 0.0  ;;  %vm1131_vm12 = vcmp.eq.s32.totalorder %v2817_v22, 16  ;;  %vm1196_vm13 = vcmp.eq.s32.totalorder %v2817_v22, 17  ;;  %v2644_v45 = vld [vmem:[%s3275_s2 + $0x180] sm:$0xff]   ;;  %v2645_v47 = vld [vmem:[%s3275_s2 + $0x190] sm:$0xff]  }
  0x4a   :  { %2478 = vmatmul.mubr.msk.bf16.vlgmr.msra.gmra.mrb[32].mxu1 %vm47_vm1, %v2735_v6  ;;  %2482 = vmatpush3.bf16.msra.mxu0 %v2632_v5  ;;  %v1068_v25 = vsel %vm47_vm1, %v1067_v23, 0.0  ;;  %v1132_v28 = vsel %vm1131_vm12, %v2843_v26, 0.0  ;;  %v1197_v29 = vsel %vm1196_vm13, %v2843_v26, 0.0  ;;  %vm1261_vm14 = vcmp.eq.s32.totalorder %v2817_v22, 18  ;;  %v2646_v49 = vld [vmem:[%s3275_s2 + $0x188] sm:$0xff]   ;;  %v2648_v52 = vld [vmem:[%s3275_s2 + $0x1a0] sm:$0xff]  }
  0x4b   :  { %2490 = vmatpush3.bf16.msra.mxu1 %v2633_v10  ;;  %2483 = vmatprep.subr.bf16.mxu0 %v2684_v1  ;;  %v1133_v31 = vsel %vm47_vm1, %v1132_v28, 0.0  ;;  %v1198_v33 = vsel %vm47_vm1, %v1197_v29, 0.0  ;;  %v1262_v34 = vsel %vm1261_vm14, %v2843_v26, 0.0  ;;  %vm1326_vm15 = vcmp.eq.s32.totalorder %v2817_v22, 19  ;;  %v2649_v54 = vld [vmem:[%s3275_s2 + $0x1b0] sm:$0xff]   ;;  %v2650_v55 = vld [vmem:[%s3275_s2 + $0x1a8] sm:$0xff]  }
  0x4c   :  { %2491 = vmatprep.subr.bf16.mxu1 %v2684_v1  ;;  %2485 = vmatprep.mubr.msk.bf16.mxu0 %vm2685_vm0, %v2684_v1  ;;  %vm1391_vm2 = vcmp.eq.s32.totalorder %v2817_v22, 20  ;;  %v1263_v36 = vsel %vm47_vm1, %v1262_v34, 0.0  ;;  %v1327_v38 = vsel %vm1326_vm15, %v2843_v26, 0.0  ;;  %vm1456_vm3 = vcmp.eq.s32.totalorder %v2817_v22, 21  ;;  %v2651_v57 = vld [vmem:[%s3275_s2 + $0x1b8] sm:$0xff]   ;;  %v2652_v59 = vld [vmem:[%s3275_s2 + $0x1c0] sm:$0xff]  }
  0x4d   :  { %2493 = vmatprep.mubr.msk.bf16.mxu1 %vm2685_vm0, %v2684_v1  ;;  %939 = vadd.xlane.f32.xlu1 %v938_v19  ;;  %v1392_v39 = vsel %vm1391_vm2, %v2843_v26, 0.0  ;;  %v1328_v41 = vsel %vm47_vm1, %v1327_v38, 0.0  ;;  %v1457_v44 = vsel %vm1456_vm3, %v2843_v26, 0.0  ;;  %vm1521_vm4 = vcmp.eq.s32.totalorder %v2817_v22, 22  ;;  %v2653_v61 = vld [vmem:[%s3275_s2 + $0x1d0] sm:$0xff]   ;;  %v2654_v62 = vld [vmem:[%s3275_s2 + $0x1c8] sm:$0xff]  }
  0x4e   :  { %2484 = vmatpush3.bf16.msra.mxu0 %v2634_v18  ;;  %1004 = vadd.xlane.f32.xlu0 %v1003_v21  ;;  %v1393_v43 = vsel %vm47_vm1, %v1392_v39, 0.0  ;;  %vm1586_vm5 = vcmp.eq.s32.totalorder %v2817_v22, 23  ;;  %v1458_v46 = vsel %vm47_vm1, %v1457_v44, 0.0  ;;  %v1522_v48 = vsel %vm1521_vm4, %v2843_v26, 0.0  ;;  %v2655_v0 = vld [vmem:[%s3275_s2 + $0x1d8] sm:$0xff]   ;;  %v2656_v3 = vld [vmem:[%s3275_s2 + $0x1e0] sm:$0xff]  }
  0x4f   :  { %2492 = vmatpush3.bf16.msra.mxu1 %v2635_v20  ;;  %2497 = vmatprep.subr.bf16.mxu0 %v2684_v1  ;;  %v1587_v22 = vsel %vm1586_vm5, %v2843_v26, 0.0  ;;  %v1523_v50 = vsel %vm47_vm1, %v1522_v48, 0.0  ;;  %v2647_v26 = vld [vmem:[%s3275_s2 + $0x198] sm:$0xff]   ;;  %v1653_v53 = vsel %vm47_vm1, %v2992_v4, 0.0  ;;  %v1718_v56 = vsel %vm47_vm1, %v3003_v8, 0.0  ;;  %v2657_v5 = vld [vmem:[%s3275_s2 + $0x1f0] sm:$0xff]  }
  0x50   :  { %2505 = vmatprep.subr.bf16.mxu1 %v2684_v1  ;;  %v1588_v51 = vsel %vm47_vm1, %v1587_v22, 0.0  ;;  %v1783_v58 = vsel %vm47_vm1, %v3008_v9, 0.0  ;;  %v1848_v60 = vsel %vm47_vm1, %v3021_v12, 0.0  ;;  %v1913_v63 = vsel %vm47_vm1, %v3026_v13, 0.0  ;;  %v2658_v7 = vld [vmem:[%s3275_s2 + $0x1e8] sm:$0xff]   ;;  %v2659_v9 = vld [vmem:[%s3275_s2 + $0x1f8] sm:$0xff]  }
  0x51   :  { %2486 = vmatmul.mubr.msk.bf16.vlgmr.msra.gmra.mrb[36].mxu0 %vm47_vm1, %v2735_v6  ;;  %1069 = vadd.xlane.f32.xlu1 %v1068_v25  ;;  %v1978_v2 = vsel %vm47_vm1, %v3036_v15, 0.0  ;;  %v2043_v4 = vsel %vm47_vm1, %v3041_v16, 0.0  ;;  %v2108_v8 = vsel %vm47_vm1, %v3046_v17, 0.0  ;;  %vm23_vm6 = vcmask 130048   ;;  %s2686_s9 = smov [#allocation3]  }
  0x52   :  { %2494 = vmatmul.mubr.msk.bf16.vlgmr.msra.gmra.mrb[36].mxu1 %vm47_vm1, %v2735_v6  ;;  %2498 = vmatpush3.bf16.msra.mxu0 %v2636_v24  ;;  %24 = vst.msk [vmem:[#allocation2] sm:$0xff] %vm23_vm6, %v2684_v1  ;;  %s2136_s10 = sshll.u32 %s2686_s9, 4  ;;  %s2137_s10 = int_to_ptr.vmem [resolvable:$true] %s2136_s10 }
  0x53   :  { %2506 = vmatpush3.bf16.msra.mxu1 %v2637_v27  ;;  %2499 = vmatprep.subr.bf16.mxu0 %v2684_v1  ;;  %s2660_s11 = scalar_lea.vmem %s2137_s10, 128  ;;  %p2665_p1 = scmp.lt.s32.totalorder %s2137_s10, %s2137_s10 }
  0x54   :  { %2507 = vmatprep.subr.bf16.mxu1 %v2684_v1  ;;  %2501 = vmatprep.mubr.msk.bf16.mxu0 %vm2685_vm0, %v2684_v1  ;;  %p2661_p0 = scmp.ne.s32.totalorder %s2137_s10, %s2660_s11  ;;  %p2666_p2 = scmp.lt.s32.totalorder %s2660_s11, %s2660_s11 }
  0x55   :  { %2509 = vmatprep.mubr.msk.bf16.mxu1 %vm2685_vm0, %v2684_v1  ;;  %1134 = vadd.xlane.f32.xlu0 %v1133_v31 }
  0x56   :  { %2500 = vmatpush3.bf16.msra.mxu0 %v2638_v30  ;;  %1199 = vadd.xlane.f32.xlu1 %v1198_v33  ;;  %p2667_p3 = por %p2666_p2, %p2665_p1 }
  0x57   :  { %2508 = vmatpush3.bf16.msra.mxu1 %v2639_v32  ;;  %2513 = vmatprep.subr.bf16.mxu0 %v2684_v1 }
  0x58   :  { %2521 = vmatprep.subr.bf16.mxu1 %v2684_v1  ;;  %p2668_p4 = pnand %p2667_p3, %p2661_p0 }
  0x59   :  { %2502 = vmatmul.mubr.msk.bf16.vlgmr.msra.gmra.mrb[40].mxu0 %vm47_vm1, %v2735_v6  ;;  %1264 = vadd.xlane.f32.xlu0 %v1263_v36 }
  0x5a   :  { %2510 = vmatmul.mubr.msk.bf16.vlgmr.msra.gmra.mrb[40].mxu1 %vm47_vm1, %v2735_v6  ;;  %2514 = vmatpush3.bf16.msra.mxu0 %v2640_v35 }
  0x5b   :  { %2522 = vmatpush3.bf16.msra.mxu1 %v2641_v37  ;;  %2515 = vmatprep.subr.bf16.mxu0 %v2684_v1 }
  0x5c   :  { %2523 = vmatprep.subr.bf16.mxu1 %v2684_v1  ;;  %2517 = vmatprep.mubr.msk.bf16.mxu0 %vm2685_vm0, %v2684_v1 }
  0x5d   :  { %2525 = vmatprep.mubr.msk.bf16.mxu1 %vm2685_vm0, %v2684_v1  ;;  %1329 = vadd.xlane.f32.xlu1 %v1328_v41 }
  0x5e   :  { %2516 = vmatpush3.bf16.msra.mxu0 %v2642_v40  ;;  %1394 = vadd.xlane.f32.xlu0 %v1393_v43 }
  0x5f   :  { %2524 = vmatpush3.bf16.msra.mxu1 %v2643_v42  ;;  %2529 = vmatprep.subr.bf16.mxu0 %v2684_v1 }
  0x60   :  { %2537 = vmatprep.subr.bf16.mxu1 %v2684_v1 }
  0x61   :  { %2518 = vmatmul.mubr.msk.bf16.vlgmr.msra.gmra.mrb[44].mxu0 %vm47_vm1, %v2735_v6  ;;  %1459 = vadd.xlane.f32.xlu1 %v1458_v46 }
  0x62   :  { %2526 = vmatmul.mubr.msk.bf16.vlgmr.msra.gmra.mrb[44].mxu1 %vm47_vm1, %v2735_v6  ;;  %2530 = vmatpush3.bf16.msra.mxu0 %v2644_v45 }
  0x63   :  { %2538 = vmatpush3.bf16.msra.mxu1 %v2645_v47  ;;  %2531 = vmatprep.subr.bf16.mxu0 %v2684_v1 }
  0x64   :  { %2539 = vmatprep.subr.bf16.mxu1 %v2684_v1  ;;  %2533 = vmatprep.mubr.msk.bf16.mxu0 %vm2685_vm0, %v2684_v1 }
  0x65   :  { %2541 = vmatprep.mubr.msk.bf16.mxu1 %vm2685_vm0, %v2684_v1  ;;  %1524 = vadd.xlane.f32.xlu0 %v1523_v50 }
  0x66   :  { %2532 = vmatpush3.bf16.msra.mxu0 %v2646_v49  ;;  %1589 = vadd.xlane.f32.xlu1 %v1588_v51 }
  0x67   :  { %2540 = vmatpush3.bf16.msra.mxu1 %v2647_v26  ;;  %2545 = vmatprep.subr.bf16.mxu0 %v2684_v1 }
  0x68   :  { %2553 = vmatprep.subr.bf16.mxu1 %v2684_v1 }
  0x69   :  { %2534 = vmatmul.mubr.msk.bf16.vlgmr.msra.gmra.mrb[48].mxu0 %vm47_vm1, %v2735_v6  ;;  %1654 = vadd.xlane.f32.xlu0 %v1653_v53 }
  0x6a   :  { %2542 = vmatmul.mubr.msk.bf16.vlgmr.msra.gmra.mrb[48].mxu1 %vm47_vm1, %v2735_v6  ;;  %2546 = vmatpush3.bf16.msra.mxu0 %v2648_v52 }
  0x6b   :  { %2554 = vmatpush3.bf16.msra.mxu1 %v2649_v54  ;;  %2547 = vmatprep.subr.bf16.mxu0 %v2684_v1 }
  0x6c   :  { %2555 = vmatprep.subr.bf16.mxu1 %v2684_v1  ;;  %2549 = vmatprep.mubr.msk.bf16.mxu0 %vm2685_vm0, %v2684_v1 }
  0x6d   :  { %2557 = vmatprep.mubr.msk.bf16.mxu1 %vm2685_vm0, %v2684_v1  ;;  %1719 = vadd.xlane.f32.xlu1 %v1718_v56 }
  0x6e   :  { %2548 = vmatpush3.bf16.msra.mxu0 %v2650_v55  ;;  %1784 = vadd.xlane.f32.xlu0 %v1783_v58 }
  0x6f   :  { %2556 = vmatpush3.bf16.msra.mxu1 %v2651_v57  ;;  %2561 = vmatprep.subr.bf16.mxu0 %v2684_v1 }
  0x70   :  { %2569 = vmatprep.subr.bf16.mxu1 %v2684_v1 }
  0x71   :  { %2550 = vmatmul.mubr.msk.bf16.vlgmr.msra.gmra.mrb[52].mxu0 %vm47_vm1, %v2735_v6  ;;  %1849 = vadd.xlane.f32.xlu1 %v1848_v60 }
  0x72   :  { %2558 = vmatmul.mubr.msk.bf16.vlgmr.msra.gmra.mrb[52].mxu1 %vm47_vm1, %v2735_v6  ;;  %2562 = vmatpush3.bf16.msra.mxu0 %v2652_v59 }
  0x73   :  { %2570 = vmatpush3.bf16.msra.mxu1 %v2653_v61  ;;  %2563 = vmatprep.subr.bf16.mxu0 %v2684_v1 }
  0x74   :  { %2571 = vmatprep.subr.bf16.mxu1 %v2684_v1  ;;  %2565 = vmatprep.mubr.msk.bf16.mxu0 %vm2685_vm0, %v2684_v1 }
  0x75   :  { %2573 = vmatprep.mubr.msk.bf16.mxu1 %vm2685_vm0, %v2684_v1  ;;  %1914 = vadd.xlane.f32.xlu0 %v1913_v63 }
  0x76   :  { %2564 = vmatpush3.bf16.msra.mxu0 %v2654_v62  ;;  %1979 = vadd.xlane.f32.xlu1 %v1978_v2 }
  0x77   :  { %2572 = vmatpush3.bf16.msra.mxu1 %v2655_v0  ;;  %2577 = vmatprep.subr.bf16.mxu0 %v2684_v1 }
  0x78   :  { %2585 = vmatprep.subr.bf16.mxu1 %v2684_v1 }
  0x79   :  { %2566 = vmatmul.mubr.msk.bf16.vlgmr.msra.gmra.mrb[56].mxu0 %vm47_vm1, %v2735_v6  ;;  %2044 = vadd.xlane.f32.xlu0 %v2043_v4 }
  0x7a   :  { %2574 = vmatmul.mubr.msk.bf16.vlgmr.msra.gmra.mrb[56].mxu1 %vm47_vm1, %v2735_v6  ;;  %2578 = vmatpush3.bf16.msra.mxu0 %v2656_v3 }
  0x7b   :  { %2586 = vmatpush3.bf16.msra.mxu1 %v2657_v5  ;;  %2579 = vmatprep.subr.bf16.mxu0 %v2684_v1 }
  0x7c   :  { %2587 = vmatprep.subr.bf16.mxu1 %v2684_v1  ;;  %2581 = vmatprep.mubr.msk.bf16.mxu0 %vm2685_vm0, %v2684_v1 }
  0x7d   :  { %2589 = vmatprep.mubr.msk.bf16.mxu1 %vm2685_vm0, %v2684_v1  ;;  %2109 = vadd.xlane.f32.xlu1 %v2108_v8 }
  0x7e   :  { %2580 = vmatpush3.bf16.msra.mxu0 %v2658_v7 }
  0x7f   :  { %2588 = vmatpush3.bf16.msra.mxu1 %v2659_v9 }
  0x81   :  { %2582 = vmatmul.mubr.msk.bf16.vlgmr.msra.gmra.mrb[60].mxu0 %vm47_vm1, %v2735_v6 }
  0x82   :  { %2590 = vmatmul.mubr.msk.bf16.vlgmr.msra.gmra.mrb[60].mxu1 %vm47_vm1, %v2735_v6 }
  0x9a   :  { %v96_v10 = vpop.xlane.xlu0 %95 }
  0x9b   :  { %v225_v13 = vpop.xlane.xlu1 %224 }
  0x9e   :  { %v160_v11 = vpop.xlane.xlu0 %159 }
  0xa2   :  { %v355_v37 = vpop.xlane.xlu0 %354 }
  0xa3   :  { %v290_v25 = vpop.xlane.xlu1 %289 }
  0xa6   :  { %v485_v50 = vpop.xlane.xlu0 %484 }
  0xaa   :  { %v420_v38 = vpop.xlane.xlu1 %419 }
  0xab   :  { %v615_v63 = vpop.xlane.xlu0 %614 }
  0xae   :  { %v550_v26 = vpop.xlane.xlu1 %549 }
  0xb2   :  { %v680_v0 = vpop.xlane.xlu1 %679 }
  0xdc   :  { %v85_v12 = vpop.f32.mrb[0].mxu0 }
  0xdd   :  { %v97_v14 = vmul.f32 %v96_v10, %v85_v12  ;;  %v148_v15 = vpop.f32.mrb[0].mxu1  ;;  %v2343_v16 = vpop.f32.mrb[1].mxu0 }
  0xde   :  { %v161_v17 = vmul.f32 %v160_v11, %v148_v15  ;;  %v2351_v18 = vpop.f32.mrb[1].mxu1  ;;  %v88_v19 = vpop.f32.mrb[2].mxu0 }
  0xdf   :  { %v151_v20 = vpop.f32.mrb[2].mxu1  ;;  %v2344_v21 = vpop.f32.mrb[3].mxu0 }
  0xe0   :  { %v162_v23 = vadd.f32 %v161_v17, %v97_v14  ;;  %v2352_v24 = vpop.f32.mrb[3].mxu1  ;;  %v745_v15 = vpop.xlane.xlu0 %744 }
  0xe1   :  { %v810_v16 = vpop.xlane.xlu1 %809 }
  0xe4   :  { %v213_v6 = vpop.f32.mrb[4].mxu0 }
  0xe5   :  { %v226_v27 = vmul.f32 %v225_v13, %v213_v6  ;;  %v278_v28 = vpop.f32.mrb[4].mxu1  ;;  %v2359_v29 = vpop.f32.mrb[5].mxu0 }
  0xe6   :  { %v2367_v1 = vpop.f32.mrb[5].mxu1  ;;  %v291_v30 = vmul.f32 %v290_v25, %v278_v28  ;;  %v216_v31 = vpop.f32.mrb[6].mxu0 }
  0xe7   :  { %v227_v32 = vadd.f32 %v226_v27, %v162_v23  ;;  %v281_v33 = vpop.f32.mrb[6].mxu1  ;;  %v2360_v34 = vpop.f32.mrb[7].mxu0 }
  0xe8   :  { %v2368_v35 = vpop.f32.mrb[7].mxu1  ;;  %v875_v1 = vpop.xlane.xlu0 %874 }
  0xe9   :  { %v292_v36 = vadd.f32 %v291_v30, %v227_v32  ;;  %v940_v30 = vpop.xlane.xlu1 %939 }
  0xec   :  { %v343_v39 = vpop.f32.mrb[8].mxu0 }
  0xed   :  { %v356_v40 = vmul.f32 %v355_v37, %v343_v39  ;;  %v408_v41 = vpop.f32.mrb[8].mxu1  ;;  %v2375_v42 = vpop.f32.mrb[9].mxu0 }
  0xee   :  { %v2383_v43 = vpop.f32.mrb[9].mxu1  ;;  %v421_v44 = vmul.f32 %v420_v38, %v408_v41  ;;  %v346_v45 = vpop.f32.mrb[10].mxu0 }
  0xef   :  { %v357_v46 = vadd.f32 %v356_v40, %v292_v36  ;;  %v411_v47 = vpop.f32.mrb[10].mxu1  ;;  %v2376_v48 = vpop.f32.mrb[11].mxu0 }
  0xf0   :  { %v2384_v22 = vpop.f32.mrb[11].mxu1  ;;  %v1005_v43 = vpop.xlane.xlu0 %1004 }
  0xf1   :  { %v422_v49 = vadd.f32 %v421_v44, %v357_v46  ;;  %v1070_v44 = vpop.xlane.xlu1 %1069 }
  0xf4   :  { %v473_v51 = vpop.f32.mrb[12].mxu0 }
  0xf5   :  { %v486_v52 = vmul.f32 %v485_v50, %v473_v51  ;;  %v538_v53 = vpop.f32.mrb[12].mxu1  ;;  %v2391_v54 = vpop.f32.mrb[13].mxu0 }
  0xf6   :  { %v2399_v55 = vpop.f32.mrb[13].mxu1  ;;  %v551_v56 = vmul.f32 %v550_v26, %v538_v53  ;;  %v476_v57 = vpop.f32.mrb[14].mxu0 }
  0xf7   :  { %v487_v58 = vadd.f32 %v486_v52, %v422_v49  ;;  %v541_v59 = vpop.f32.mrb[14].mxu1  ;;  %v2392_v60 = vpop.f32.mrb[15].mxu0 }
  0xf8   :  { %v2400_v61 = vpop.f32.mrb[15].mxu1  ;;  %v1135_v55 = vpop.xlane.xlu0 %1134 }
  0xf9   :  { %v552_v62 = vadd.f32 %v551_v56, %v487_v58  ;;  %v1200_v56 = vpop.xlane.xlu1 %1199 }
  0xfc   :  { %v603_v2 = vpop.f32.mrb[16].mxu0 }
  0xfd   :  { %v616_v3 = vmul.f32 %v615_v63, %v603_v2  ;;  %v668_v4 = vpop.f32.mrb[16].mxu1  ;;  %v2407_v5 = vpop.f32.mrb[17].mxu0 }
  0xfe   :  { %v2415_v7 = vpop.f32.mrb[17].mxu1  ;;  %v681_v8 = vmul.f32 %v680_v0, %v668_v4  ;;  %v606_v9 = vpop.f32.mrb[18].mxu0 }
  0xff   :  { %v617_v10 = vadd.f32 %v616_v3, %v552_v62  ;;  %v671_v11 = vpop.f32.mrb[18].mxu1  ;;  %v2408_v12 = vpop.f32.mrb[19].mxu0 }
 0x100   :  { %v2416_v13 = vpop.f32.mrb[19].mxu1  ;;  %v1265_v7 = vpop.xlane.xlu0 %1264 }
 0x101   :  { %v682_v14 = vadd.f32 %v681_v8, %v617_v10  ;;  %v1330_v8 = vpop.xlane.xlu1 %1329 }
 0x104   :  { %v733_v17 = vpop.f32.mrb[20].mxu0 }
 0x105   :  { %v746_v18 = vmul.f32 %v745_v15, %v733_v17  ;;  %v798_v19 = vpop.f32.mrb[20].mxu1  ;;  %v2423_v20 = vpop.f32.mrb[21].mxu0 }
 0x106   :  { %v2431_v21 = vpop.f32.mrb[21].mxu1  ;;  %v811_v23 = vmul.f32 %v810_v16, %v798_v19  ;;  %v736_v24 = vpop.f32.mrb[22].mxu0 }
 0x107   :  { %v747_v25 = vadd.f32 %v746_v18, %v682_v14  ;;  %v801_v6 = vpop.f32.mrb[22].mxu1  ;;  %v2424_v27 = vpop.f32.mrb[23].mxu0 }
 0x108   :  { %v2432_v28 = vpop.f32.mrb[23].mxu1  ;;  %v1395_v21 = vpop.xlane.xlu0 %1394 }
 0x109   :  { %v812_v29 = vadd.f32 %v811_v23, %v747_v25  ;;  %v1460_v23 = vpop.xlane.xlu1 %1459 }
 0x10c   :  { %v863_v31 = vpop.f32.mrb[24].mxu0 }
 0x10d   :  { %v876_v32 = vmul.f32 %v875_v1, %v863_v31  ;;  %v928_v33 = vpop.f32.mrb[24].mxu1  ;;  %v2439_v34 = vpop.f32.mrb[25].mxu0 }
 0x10e   :  { %v2447_v35 = vpop.f32.mrb[25].mxu1  ;;  %v941_v36 = vmul.f32 %v940_v30, %v928_v33  ;;  %v866_v37 = vpop.f32.mrb[26].mxu0 }
 0x10f   :  { %v877_v38 = vadd.f32 %v876_v32, %v812_v29  ;;  %v931_v39 = vpop.f32.mrb[26].mxu1  ;;  %v2440_v40 = vpop.f32.mrb[27].mxu0 }
 0x110   :  { %v2448_v41 = vpop.f32.mrb[27].mxu1  ;;  %v1525_v35 = vpop.xlane.xlu0 %1524 }
 0x111   :  { %v942_v42 = vadd.f32 %v941_v36, %v877_v38  ;;  %v1590_v36 = vpop.xlane.xlu1 %1589 }
 0x114   :  { %v993_v45 = vpop.f32.mrb[28].mxu0 }
 0x115   :  { %v1006_v46 = vmul.f32 %v1005_v43, %v993_v45  ;;  %v1058_v47 = vpop.f32.mrb[28].mxu1  ;;  %v2455_v48 = vpop.f32.mrb[29].mxu0 }
 0x116   :  { %v2463_v22 = vpop.f32.mrb[29].mxu1  ;;  %v1071_v49 = vmul.f32 %v1070_v44, %v1058_v47  ;;  %v996_v50 = vpop.f32.mrb[30].mxu0 }
 0x117   :  { %v1007_v26 = vadd.f32 %v1006_v46, %v942_v42  ;;  %v1061_v51 = vpop.f32.mrb[30].mxu1  ;;  %v2456_v52 = vpop.f32.mrb[31].mxu0 }
 0x118   :  { %v2464_v53 = vpop.f32.mrb[31].mxu1  ;;  %v1655_v22 = vpop.xlane.xlu0 %1654 }
 0x119   :  { %v1072_v54 = vadd.f32 %v1071_v49, %v1007_v26  ;;  %v1720_v49 = vpop.xlane.xlu1 %1719 }
 0x11c   :  { %v1123_v57 = vpop.f32.mrb[32].mxu0 }
 0x11d   :  { %v1136_v58 = vmul.f32 %v1135_v55, %v1123_v57  ;;  %v1188_v59 = vpop.f32.mrb[32].mxu1  ;;  %v2471_v60 = vpop.f32.mrb[33].mxu0 }
 0x11e   :  { %v2479_v61 = vpop.f32.mrb[33].mxu1  ;;  %v1201_v62 = vmul.f32 %v1200_v56, %v1188_v59  ;;  %v1126_v63 = vpop.f32.mrb[34].mxu0 }
 0x11f   :  { %v1137_v0 = vadd.f32 %v1136_v58, %v1072_v54  ;;  %v1191_v2 = vpop.f32.mrb[34].mxu1  ;;  %v2472_v3 = vpop.f32.mrb[35].mxu0 }
 0x120   :  { %v2480_v4 = vpop.f32.mrb[35].mxu1  ;;  %v1785_v61 = vpop.xlane.xlu0 %1784 }
 0x121   :  { %v1202_v5 = vadd.f32 %v1201_v62, %v1137_v0  ;;  %v1850_v62 = vpop.xlane.xlu1 %1849 }
 0x124   :  { %v1253_v9 = vpop.f32.mrb[36].mxu0 }
 0x125   :  { %v1266_v10 = vmul.f32 %v1265_v7, %v1253_v9  ;;  %v1318_v11 = vpop.f32.mrb[36].mxu1  ;;  %v2487_v12 = vpop.f32.mrb[37].mxu0 }
 0x126   :  { %v2495_v13 = vpop.f32.mrb[37].mxu1  ;;  %v1331_v14 = vmul.f32 %v1330_v8, %v1318_v11  ;;  %v1256_v15 = vpop.f32.mrb[38].mxu0 }
 0x127   :  { %v1267_v16 = vadd.f32 %v1266_v10, %v1202_v5  ;;  %v1321_v17 = vpop.f32.mrb[38].mxu1  ;;  %v2488_v18 = vpop.f32.mrb[39].mxu0 }
 0x128   :  { %v2496_v19 = vpop.f32.mrb[39].mxu1  ;;  %v1915_v13 = vpop.xlane.xlu0 %1914 }
 0x129   :  { %v1332_v20 = vadd.f32 %v1331_v14, %v1267_v16  ;;  %v1980_v14 = vpop.xlane.xlu1 %1979 }
 0x12c   :  { %v1383_v24 = vpop.f32.mrb[40].mxu0 }
 0x12d   :  { %v1396_v25 = vmul.f32 %v1395_v21, %v1383_v24  ;;  %v1448_v6 = vpop.f32.mrb[40].mxu1  ;;  %v2503_v27 = vpop.f32.mrb[41].mxu0 }
 0x12e   :  { %v2511_v28 = vpop.f32.mrb[41].mxu1  ;;  %v1461_v29 = vmul.f32 %v1460_v23, %v1448_v6  ;;  %v1386_v1 = vpop.f32.mrb[42].mxu0 }
 0x12f   :  { %v1397_v30 = vadd.f32 %v1396_v25, %v1332_v20  ;;  %v1451_v31 = vpop.f32.mrb[42].mxu1  ;;  %v2504_v32 = vpop.f32.mrb[43].mxu0 }
 0x130   :  { %v2512_v33 = vpop.f32.mrb[43].mxu1  ;;  %v2045_v28 = vpop.xlane.xlu0 %2044 }
 0x131   :  { %v1462_v34 = vadd.f32 %v1461_v29, %v1397_v30  ;;  %v2110_v29 = vpop.xlane.xlu1 %2109 }
 0x134   :  { %v1513_v37 = vpop.f32.mrb[44].mxu0 }
 0x135   :  { %v1526_v38 = vmul.f32 %v1525_v35, %v1513_v37  ;;  %v1578_v39 = vpop.f32.mrb[44].mxu1  ;;  %v2519_v40 = vpop.f32.mrb[45].mxu0 }
 0x136   :  { %v2527_v41 = vpop.f32.mrb[45].mxu1  ;;  %v1591_v42 = vmul.f32 %v1590_v36, %v1578_v39  ;;  %v1516_v43 = vpop.f32.mrb[46].mxu0  ;;  %v2113_v40 = vld [vmem:[#allocation2] sm:$0xff] }
 0x137   :  { %v1527_v44 = vadd.f32 %v1526_v38, %v1462_v34  ;;  %v1581_v45 = vpop.f32.mrb[46].mxu1  ;;  %v2520_v46 = vpop.f32.mrb[47].mxu0  ;;  %v2240_v43 = vld [vmem:[%s3276_s3] ss:$0 sm:$0xff] }
 0x138   :  { %v2528_v47 = vpop.f32.mrb[47].mxu1 }
 0x139   :  { %v1592_v48 = vadd.f32 %v1591_v42, %v1527_v44 }
 0x13c   :  { %v1643_v50 = vpop.f32.mrb[48].mxu0 }
 0x13d   :  { %v1656_v26 = vmul.f32 %v1655_v22, %v1643_v50  ;;  %v1708_v51 = vpop.f32.mrb[48].mxu1  ;;  %v2535_v52 = vpop.f32.mrb[49].mxu0 }
 0x13e   :  { %v2543_v53 = vpop.f32.mrb[49].mxu1  ;;  %v1721_v54 = vmul.f32 %v1720_v49, %v1708_v51  ;;  %v1646_v55 = vpop.f32.mrb[50].mxu0 }
 0x13f   :  { %v1657_v56 = vadd.f32 %v1656_v26, %v1592_v48  ;;  %v1711_v57 = vpop.f32.mrb[50].mxu1  ;;  %v2536_v58 = vpop.f32.mrb[51].mxu0 }
 0x140   :  { %v2544_v59 = vpop.f32.mrb[51].mxu1 }
 0x141   :  { %v1722_v60 = vadd.f32 %v1721_v54, %v1657_v56 }
 0x144   :  { %v1773_v63 = vpop.f32.mrb[52].mxu0 }
 0x145   :  { %v1786_v0 = vmul.f32 %v1785_v61, %v1773_v63  ;;  %v1838_v2 = vpop.f32.mrb[52].mxu1  ;;  %v2551_v3 = vpop.f32.mrb[53].mxu0 }
 0x146   :  { %v2559_v4 = vpop.f32.mrb[53].mxu1  ;;  %v1851_v5 = vmul.f32 %v1850_v62, %v1838_v2  ;;  %v1776_v7 = vpop.f32.mrb[54].mxu0 }
 0x147   :  { %v1787_v8 = vadd.f32 %v1786_v0, %v1722_v60  ;;  %v1841_v9 = vpop.f32.mrb[54].mxu1  ;;  %v2552_v10 = vpop.f32.mrb[55].mxu0 }
 0x148   :  { %v2560_v11 = vpop.f32.mrb[55].mxu1 }
 0x149   :  { %v1852_v12 = vadd.f32 %v1851_v5, %v1787_v8 }
 0x14c   :  { %v1903_v15 = vpop.f32.mrb[56].mxu0 }
 0x14d   :  { %v1916_v16 = vmul.f32 %v1915_v13, %v1903_v15  ;;  %v1968_v17 = vpop.f32.mrb[56].mxu1  ;;  %v2567_v18 = vpop.f32.mrb[57].mxu0 }
 0x14e   :  { %v2575_v19 = vpop.f32.mrb[57].mxu1  ;;  %v1981_v20 = vmul.f32 %v1980_v14, %v1968_v17  ;;  %v1906_v21 = vpop.f32.mrb[58].mxu0 }
 0x14f   :  { %v1917_v23 = vadd.f32 %v1916_v16, %v1852_v12  ;;  %v1971_v24 = vpop.f32.mrb[58].mxu1  ;;  %v2568_v25 = vpop.f32.mrb[59].mxu0 }
 0x150   :  { %v2576_v6 = vpop.f32.mrb[59].mxu1 }
 0x151   :  { %v1982_v27 = vadd.f32 %v1981_v20, %v1917_v23 }
 0x154   :  { %v2033_v1 = vpop.f32.mrb[60].mxu0 }
 0x155   :  { %v2046_v30 = vmul.f32 %v2045_v28, %v2033_v1  ;;  %v2098_v31 = vpop.f32.mrb[60].mxu1  ;;  %v2583_v32 = vpop.f32.mrb[61].mxu0 }
 0x156   :  { %v2591_v33 = vpop.f32.mrb[61].mxu1  ;;  %v2111_v34 = vmul.f32 %v2110_v29, %v2098_v31  ;;  %v2036_v35 = vpop.f32.mrb[62].mxu0 }
 0x157   :  { %v2047_v36 = vadd.f32 %v2046_v30, %v1982_v27  ;;  %v2101_v37 = vpop.f32.mrb[62].mxu1  ;;  %v2584_v38 = vpop.f32.mrb[63].mxu0 }
 0x158   :  { %v2592_v39 = vpop.f32.mrb[63].mxu1 }
 0x159   :  { %v2112_v41 = vadd.f32 %v2111_v34, %v2047_v36 }
 0x15b   :  { %v2114_v42 = vadd.f32 %v2113_v40, %v2112_v41 }
 0x15d   :  { %2116 = vst.msk [vmem:[#allocation2] sm:$0xff] %vm23_vm6, %v2114_v42 }
 0x164   :  { %v2120_v44 = vld [vmem:[#allocation2] sm:$0xff] }
 0x165   :  { %v2128_v45 = vadd.f32 %v2240_v43, %v2120_v44 }
 0x167   :  { %2129 = vst.msk [vmem:[#allocation3] sm:$0xff] %vm23_vm6, %v2128_v45 }
 0x168   :  { %2671 = shalt.err (!%p2668_p4)
}
 0x169   :  { %s2672_s14 = scalar_lea.hbm %s3277_s4, 128 }
 0x16a   :  { %p2673_p5 = scmp.ne.s32.totalorder %s3277_s4, %s2672_s14  ;;  %p2676_p6 = scmp.lt.u32.totalorder %s2672_s14, %s3277_s4 }
 0x16c   :  { %p2678_p7 = pnand %p2676_p6, %p2673_p5 }
 0x16e   :  { %2681 = shalt.err (!%p2678_p7)
}
 0x16f   :  { %2139 = dma.vmem_to_hbm [thread:$0]  %s2137_s10, 128, %s3277_s4, [#allocation4]  }
 0x170   :  { %2682 = dma.done.wait [#allocation4], 128  }
 0x171   :  { %2683 = vsyncadd [#allocation4], 4294967168 }
 0x172   :  { %2143 = vsyncpa [#allocation4], 1 }

</bundles_post_ra>
